<compile_context>
chip_gen: v7x
topology: tpu7x:2x2x1
jax: 0.10.0
libtpu: 0.0.40
codegen_flags: <defaults>
</compile_context>

<pallas_src>
import functools

import jax
import jax.numpy as jnp
import numpy as np
from jax.experimental import pallas as pl
from jax.experimental.pallas import tpu as pltpu  # noqa: F401

# ----------------------------- "config" ------------------------------------
POS_FEATS = True
NODE_FEAT_SIZE = 5 if POS_FEATS else 3
EMB_SIZE = 32
MP_ITERS = 3
GRID_SIDE = 8
NN = GRID_SIDE * GRID_SIDE       # nodes per graph (Sokoban 8x8 grid)
G = 2                            # graphs in the batch
GN = G * NN                      # 128 flattened nodes -> the lane axis
NEG_SLOPE = 0.01                 # torch LeakyReLU default
HEAD_ROWS = 16                   # [node(4) | action(4) | value(1) | pad(7)]
W_ROWS = 5 * EMB_SIZE + HEAD_ROWS + EMB_SIZE   # 208 rows in the packed slab
OUT_ROWS = 16


def _leaky(v):
    return jnp.where(v > 0, v, NEG_SLOPE * v)


# ------------------------------- kernel -------------------------------------
def net_kernel(feat_ref, adj_ref, w_ref, out_ref):
    dotf = functools.partial(jnp.dot, preferred_element_type=jnp.float32)
    E = EMB_SIZE

    feats_t = feat_ref[...]                  # (E, GN): rows 0-4 feats, row 5 = 1
    adj_t = adj_ref[...]                     # (GN, GN) block-diagonal adj^T

    w_emb = w_ref[0:E, :]                    # (E, E): cols 0-4 W_emb^T, col 5 b_emb
    w_msg = w_ref[E:2 * E, :]                # (E, E) = W_msg^T
    w_u1 = w_ref[2 * E:3 * E, :]
    w_u2 = w_ref[3 * E:4 * E, :]
    w_u3 = w_ref[4 * E:5 * E, :]
    w_head = w_ref[5 * E:5 * E + HEAD_ROWS, :]      # (16, E): node/action/value^T
    bias_blk = w_ref[5 * E + HEAD_ROWS:W_ROWS, :]   # (E, E): bias columns

    # lane-broadcast biases hoisted out of the MP loop (broadcast_in_dim is not CSE'd)
    b_msg = jnp.broadcast_to(bias_blk[:, 0:1], (E, GN))
    b_upd = jnp.broadcast_to(bias_blk[:, 1:2], (E, GN))
    b_head_pooled = bias_blk[0:5, 2:3]              # (5,1): [b_act(4); b_val]

    # graph-0 lane mask + mean scale (loop-invariant)
    lane = jax.lax.broadcasted_iota(jnp.int32, (1, GN), 1)
    g0 = lane < NN
    inv_nn = jnp.float32(1.0 / NN)

    # embed_node: Linear(F, E) + LeakyReLU (bias folded via the ones-row of feats_t)
    x = _leaky(dotf(w_emb, feats_t))                # (E, GN)

    # MultiMessagePassing: message -> edge-weighted aggregate -> update
    for _ in range(MP_ITERS):
        msg = _leaky(dotf(w_msg, x) + b_msg)        # (E, GN)
        agg = dotf(msg, adj_t)                      # (E, GN) block-diag matmul
        # per-graph mean of the *pre-update* x, broadcast over each 64-lane segment
        x0 = jnp.where(g0, x, 0.0)
        p0 = jnp.sum(x0, axis=1, keepdims=True) * inv_nn
        p1 = jnp.sum(x - x0, axis=1, keepdims=True) * inv_nn
        pooled = jnp.where(g0, p0, p1)              # (E, GN)
        x = _leaky(dotf(w_u1, x) + dotf(w_u2, agg) + dotf(w_u3, pooled) + b_upd)

    # fused heads (node-select bias omitted: constant along node-softmax axis)
    heads = dotf(w_head, x)                         # (16, GN)

    # node softmax over each graph's 64 node lanes
    nl = heads[0:4, :]                              # (4, GN)
    neg = jnp.float32(-1e30)
    mx0 = jnp.max(jnp.where(g0, nl, neg), axis=1, keepdims=True)
    mx1 = jnp.max(jnp.where(g0, neg, nl), axis=1, keepdims=True)
    e = jnp.exp(nl - jnp.where(g0, mx0, mx1))
    s0 = jnp.sum(jnp.where(g0, e, 0.0), axis=1, keepdims=True)
    s1 = jnp.sum(jnp.where(g0, 0.0, e), axis=1, keepdims=True)
    node_sm = e * jnp.where(g0, pl.reciprocal(s0, approx=True),
                            pl.reciprocal(s1, approx=True))     # (4, GN)

    # pooled heads per graph (= mean(x) @ [W_act | W_val] by linearity) + biases
    hp = heads[4:9, :]                              # (5, GN)
    hp0 = jnp.where(g0, hp, 0.0)
    ph0 = jnp.sum(hp0, axis=1, keepdims=True) * inv_nn + b_head_pooled   # (5,1)
    ph1 = jnp.sum(hp - hp0, axis=1, keepdims=True) * inv_nn + b_head_pooled

    def _act_softmax(col):                          # (5,1) -> probs (4,1), value (1,1)
        a = col[0:4, :]
        a = a - jnp.max(a, axis=0, keepdims=True)
        ea = jnp.exp(a)
        inv = pl.reciprocal(jnp.sum(ea, axis=0, keepdims=True), approx=True)
        return ea * inv, col[4:5, :]

    pr0, v0 = _act_softmax(ph0)
    pr1, v1 = _act_softmax(ph1)

    out_ref[0:4, :] = node_sm                       # rows 0-3: node softmax^T
    out_ref[4:8, :] = jnp.where(g0, pr0, pr1)       # rows 4-7: action probs / segment
    out_ref[8:9, :] = jnp.where(g0, v0, v1)         # row  8  : value / segment
    out_ref[9:OUT_ROWS, :] = jnp.zeros((OUT_ROWS - 9, GN), jnp.float32)


# --------------------------- packing (inside jit) ----------------------------
def _pack_feats(feats):
    ft = jnp.zeros((EMB_SIZE, GN), jnp.float32)
    ft = ft.at[:NODE_FEAT_SIZE, :].set(feats.reshape(GN, NODE_FEAT_SIZE).T)
    ft = ft.at[NODE_FEAT_SIZE, :].set(1.0)          # ones-row -> folds the embed bias
    return ft


def _pack_adj(adj):
    """Block-diagonal adj^T so the lane-major kernel can do msg_t @ adj_t."""
    a = jnp.zeros((GN, GN), jnp.float32)
    for g in range(G):
        sl = slice(g * NN, (g + 1) * NN)
        a = a.at[sl, sl].set(adj[g].T)
    return a


def _pack_params(params):
    (w_emb, b_emb, w_msg, b_msg, w_u1, w_u2, w_u3, b_upd,
     w_act, b_act, w_node, b_node, w_val, b_val) = params
    E = EMB_SIZE
    emb_blk = jnp.zeros((E, E), jnp.float32)
    emb_blk = emb_blk.at[:, :NODE_FEAT_SIZE].set(w_emb.T)
    emb_blk = emb_blk.at[:, NODE_FEAT_SIZE].set(b_emb[0])
    head_blk = jnp.zeros((HEAD_ROWS, E), jnp.float32)
    head_blk = head_blk.at[0:4, :].set(w_node.T)    # b_node cancels in node softmax
    head_blk = head_blk.at[4:8, :].set(w_act.T)
    head_blk = head_blk.at[8:9, :].set(w_val.T)
    bias_blk = jnp.zeros((E, E), jnp.float32)
    bias_blk = bias_blk.at[:, 0].set(b_msg[0])
    bias_blk = bias_blk.at[:, 1].set(b_upd[0])
    bias_blk = bias_blk.at[0:4, 2].set(b_act[0])
    bias_blk = bias_blk.at[4, 2].set(b_val[0, 0])
    return jnp.concatenate(
        [emb_blk, w_msg.T, w_u1.T, w_u2.T, w_u3.T, head_blk, bias_blk], axis=0)  # (208, 32)


# ------------------------------ wrapper --------------------------------------
@jax.jit
def net_forward(feats, adj, params):
    out = pl.pallas_call(
        net_kernel,
        out_shape=jax.ShapeDtypeStruct((OUT_ROWS, GN), jnp.float32),
    )(_pack_feats(feats), _pack_adj(adj), _pack_params(params))
    node_sm = out[0:4, :].T.reshape(G, NN, 4)
    pooled = out[4:9, :].reshape(5, G, NN)[:, :, 0]     # (5, G) per-graph values
    act_probs = pooled[0:4, :].T                        # (G, 4)
    value = pooled[4:5, :].T                            # (G, 1)
    return act_probs, node_sm, value


# --------------------------- plain-JAX reference -----------------------------
def reference_forward(feats, adj, params):
    (w_emb, b_emb, w_msg, b_msg, w_u1, w_u2, w_u3, b_upd,
     w_act, b_act, w_node, b_node, w_val, b_val) = params
    hp = jax.lax.Precision.HIGHEST
    ein = functools.partial(jnp.einsum, precision=hp)

    x = _leaky(ein('gnf,fe->gne', feats, w_emb) + b_emb)
    pooled = x.mean(axis=1, keepdims=True)
    for _ in range(MP_ITERS):
        msg = _leaky(ein('gne,ef->gnf', x, w_msg) + b_msg)
        agg = ein('gnm,gme->gne', adj, msg)
        x = _leaky(ein('gne,ef->gnf', x, w_u1)
                   + ein('gne,ef->gnf', agg, w_u2)
                   + ein('gne,ef->gnf', pooled, w_u3) + b_upd)
        pooled = x.mean(axis=1, keepdims=True)
    pooled2 = pooled[:, 0, :]
    value = ein('ge,ef->gf', pooled2, w_val) + b_val
    act_probs = jax.nn.softmax(ein('ge,ef->gf', pooled2, w_act) + b_act, axis=-1)
    node_sm = jax.nn.softmax(ein('gne,ef->gnf', x, w_node) + b_node, axis=1)
    return act_probs, node_sm, value


# ------------------------------ param init -----------------------------------
def init_params(key):
    def linear(k, fan_in, fan_out):
        lim = 1.0 / np.sqrt(fan_in)
        kw, kb = jax.random.split(k)
        w = jax.random.uniform(kw, (fan_in, fan_out), jnp.float32, -lim, lim)
        b = jax.random.uniform(kb, (1, fan_out), jnp.float32, -lim, lim)
        return w, b

    ks = jax.random.split(key, 8)
    w_emb, b_emb = linear(ks[0], NODE_FEAT_SIZE, EMB_SIZE)
    w_msg, b_msg = linear(ks[1], EMB_SIZE, EMB_SIZE)
    w_u1, _ = linear(ks[2], EMB_SIZE, EMB_SIZE)
    w_u2, _ = linear(ks[3], EMB_SIZE, EMB_SIZE)
    w_u3, b_upd = linear(ks[4], EMB_SIZE, EMB_SIZE)
    w_act, b_act = linear(ks[5], EMB_SIZE, 4)
    w_node, b_node = linear(ks[6], EMB_SIZE, 4)
    w_val, b_val = linear(ks[7], EMB_SIZE, 1)
    return [w_emb, b_emb, w_msg, b_msg, w_u1, w_u2, w_u3, b_upd,
            w_act, b_act, w_node, b_node, w_val, b_val]


def build_inputs(key):
    kf, ke = jax.random.split(key)
    feats = jax.random.uniform(kf, (G, NN, NODE_FEAT_SIZE), jnp.float32)

    # 4-connected grid graph (same topology for every graph, as in Sokoban)
    src, dst = [], []
    for r in range(GRID_SIDE):
        for c in range(GRID_SIDE):
            i = r * GRID_SIDE + c
            for dr, dc in ((0, 1), (0, -1), (1, 0), (-1, 0)):
                rr, cc = r + dr, c + dc
                if 0 <= rr < GRID_SIDE and 0 <= cc < GRID_SIDE:
                    src.append(i)
                    dst.append(rr * GRID_SIDE + cc)
    src = jnp.array(src, jnp.int32)
    dst = jnp.array(dst, jnp.int32)
    edge_attr = jax.random.uniform(ke, (G, src.shape[0], 4), jnp.float32)
    edge_w = edge_attr.mean(axis=-1)                      # scalar edge weight
    adj = jnp.zeros((G, NN, NN), jnp.float32)
    adj = adj.at[:, dst, src].add(edge_w)                 # A[g, dst, src] = w
    return feats, adj


# --------------------------------- main ---------------------------------------
if __name__ == "__main__":
    key = jax.random.PRNGKey(0)
    k_param, k_input, k_sample = jax.random.split(key, 3)

    params = init_params(k_param)
    feats, adj = build_inputs(k_input)

    act_probs, node_sm, value = net_forward(feats, adj, params)
    jax.block_until_ready((act_probs, node_sm, value))

    # sanity check against a pure-JAX reference (complete=True branch)
    ref_a, ref_n, ref_v = reference_forward(feats, adj, params)
    np.testing.assert_allclose(np.asarray(act_probs), np.asarray(ref_a),
                               rtol=1e-2, atol=1e-2)
    np.testing.assert_allclose(np.asarray(node_sm), np.asarray(ref_n),
                               rtol=1e-2, atol=1e-2)
    np.testing.assert_allclose(np.asarray(value), np.asarray(ref_v),
                               rtol=1e-2, atol=1e-2)

    # default (stochastic) forward branch, reproduced as glue on kernel outputs
    ka, kn = jax.random.split(k_sample)
    action_selected = jax.random.categorical(
        ka, jnp.log(jnp.maximum(act_probs, 1e-30)), axis=-1)                  # (G,)
    node_probs = jnp.take_along_axis(
        node_sm, jnp.repeat(action_selected[:, None, None], NN, axis=1), axis=2)[..., 0]  # (G, NN)
    node_selected = jax.random.categorical(
        kn, jnp.log(jnp.maximum(node_probs, 1e-30)), axis=-1)                 # (G,)
    a_prob = jnp.take_along_axis(act_probs, action_selected[:, None], axis=1)
    n_prob = jnp.take_along_axis(node_probs, node_selected[:, None], axis=1)
    tot_prob = a_prob * n_prob
    jax.block_until_ready((action_selected, node_selected, value, tot_prob))

    print("KERNEL_OK")
</pallas_src>

<mosaic_0001>
module attributes {stable_mosaic.version = 11 : i64} {
  func.func @net_kernel(%arg0: memref<32x128xf32, #tpu.memory_space<vmem>>, %arg1: memref<128x128xf32, #tpu.memory_space<vmem>>, %arg2: memref<208x32xf32, #tpu.memory_space<vmem>>, %arg3: memref<16x128xf32, #tpu.memory_space<vmem>>) attributes {dimension_semantics = [], scalar_prefetch = 0 : i64, scratch_operands = 0 : i64, tpu.core_type = #tpu.core_type<tc>} {
    %c0 = arith.constant 0 : index
    %c0_0 = arith.constant 0 : index
    %0 = vector.load %arg0[%c0, %c0_0] : memref<32x128xf32, #tpu.memory_space<vmem>>, vector<32x128xf32>
    %c0_1 = arith.constant 0 : index
    %c0_2 = arith.constant 0 : index
    %1 = vector.load %arg1[%c0_1, %c0_2] : memref<128x128xf32, #tpu.memory_space<vmem>>, vector<128x128xf32>
    %c0_3 = arith.constant 0 : index
    %c0_4 = arith.constant 0 : index
    %2 = vector.load %arg2[%c0_3, %c0_4] : memref<208x32xf32, #tpu.memory_space<vmem>>, vector<32x32xf32>
    %c32 = arith.constant 32 : index
    %c0_5 = arith.constant 0 : index
    %3 = vector.load %arg2[%c32, %c0_5] : memref<208x32xf32, #tpu.memory_space<vmem>>, vector<32x32xf32>
    %c64 = arith.constant 64 : index
    %c0_6 = arith.constant 0 : index
    %4 = vector.load %arg2[%c64, %c0_6] : memref<208x32xf32, #tpu.memory_space<vmem>>, vector<32x32xf32>
    %c96 = arith.constant 96 : index
    %c0_7 = arith.constant 0 : index
    %5 = vector.load %arg2[%c96, %c0_7] : memref<208x32xf32, #tpu.memory_space<vmem>>, vector<32x32xf32>
    %c128 = arith.constant 128 : index
    %c0_8 = arith.constant 0 : index
    %6 = vector.load %arg2[%c128, %c0_8] : memref<208x32xf32, #tpu.memory_space<vmem>>, vector<32x32xf32>
    %c160 = arith.constant 160 : index
    %c0_9 = arith.constant 0 : index
    %7 = vector.load %arg2[%c160, %c0_9] : memref<208x32xf32, #tpu.memory_space<vmem>>, vector<16x32xf32>
    %c176 = arith.constant 176 : index
    %c0_10 = arith.constant 0 : index
    %8 = vector.load %arg2[%c176, %c0_10] : memref<208x32xf32, #tpu.memory_space<vmem>>, vector<32x32xf32>
    %9 = vector.extract_strided_slice %8 {offsets = [0, 0], sizes = [32, 1], strides = [1, 1]} : vector<32x32xf32> to vector<32x1xf32>
    %10 = vector.shape_cast %9 : vector<32x1xf32> to vector<32x1xf32>
    %11 = vector.broadcast %10 : vector<32x1xf32> to vector<32x128xf32>
    %12 = vector.extract_strided_slice %8 {offsets = [0, 1], sizes = [32, 1], strides = [1, 1]} : vector<32x32xf32> to vector<32x1xf32>
    %13 = vector.shape_cast %12 : vector<32x1xf32> to vector<32x1xf32>
    %14 = vector.broadcast %13 : vector<32x1xf32> to vector<32x128xf32>
    %15 = vector.extract_strided_slice %8 {offsets = [0, 2], sizes = [5, 1], strides = [1, 1]} : vector<32x32xf32> to vector<5x1xf32>
    %16 = tpu.iota {dimensions = array<i32: 1>} : vector<1x128xi32>
    %c64_i32 = arith.constant 64 : i32
    %17 = vector.broadcast %c64_i32 : i32 to vector<1x128xi32>
    %18 = arith.cmpi slt, %16, %17 : vector<1x128xi32>
    %cst = arith.constant dense<0.000000e+00> : vector<32x128xf32>
    %19 = tpu.matmul %2, %0, %cst {dimension_numbers = #tpu.dot_dimension_numbers<[1], [0], [0], [1], [0, 0, 1, 1], [], []>} : vector<32x32xf32>, vector<32x128xf32>, vector<32x128xf32> -> vector<32x128xf32>
    %cst_11 = arith.constant 0.000000e+00 : f32
    %20 = vector.broadcast %cst_11 : f32 to vector<32x128xf32>
    %21 = arith.cmpf ogt, %19, %20 : vector<32x128xf32>
    %cst_12 = arith.constant 0.00999999977 : f32
    %22 = vector.broadcast %cst_12 : f32 to vector<32x128xf32>
    %23 = arith.mulf %22, %19 : vector<32x128xf32>
    %24 = arith.select %21, %19, %23 : vector<32x128xi1>, vector<32x128xf32>
    %cst_13 = arith.constant dense<0.000000e+00> : vector<32x128xf32>
    %25 = tpu.matmul %3, %24, %cst_13 {dimension_numbers = #tpu.dot_dimension_numbers<[1], [0], [0], [1], [0, 0, 1, 1], [], []>} : vector<32x32xf32>, vector<32x128xf32>, vector<32x128xf32> -> vector<32x128xf32>
    %26 = arith.addf %25, %11 : vector<32x128xf32>
    %cst_14 = arith.constant 0.000000e+00 : f32
    %27 = vector.broadcast %cst_14 : f32 to vector<32x128xf32>
    %28 = arith.cmpf ogt, %26, %27 : vector<32x128xf32>
    %cst_15 = arith.constant 0.00999999977 : f32
    %29 = vector.broadcast %cst_15 : f32 to vector<32x128xf32>
    %30 = arith.mulf %29, %26 : vector<32x128xf32>
    %31 = arith.select %28, %26, %30 : vector<32x128xi1>, vector<32x128xf32>
    %cst_16 = arith.constant dense<0.000000e+00> : vector<32x128xf32>
    %32 = tpu.matmul %31, %1, %cst_16 {dimension_numbers = #tpu.dot_dimension_numbers<[1], [0], [0], [1], [0, 0, 1, 1], [], []>} : vector<32x128xf32>, vector<128x128xf32>, vector<32x128xf32> -> vector<32x128xf32>
    %cst_17 = arith.constant 0.000000e+00 : f32
    %33 = vector.shape_cast %18 : vector<1x128xi1> to vector<1x128xi1>
    %34 = vector.broadcast %33 : vector<1x128xi1> to vector<32x128xi1>
    %35 = vector.broadcast %cst_17 : f32 to vector<32x128xf32>
    %36 = arith.select %34, %24, %35 : vector<32x128xi1>, vector<32x128xf32>
    %cst_18 = arith.constant dense<0.000000e+00> : vector<32xf32>
    %37 = vector.multi_reduction <add>, %36, %cst_18 [1] : vector<32x128xf32> to vector<32xf32>
    %38 = vector.shape_cast %37 : vector<32xf32> to vector<32x1xf32>
    %cst_19 = arith.constant 1.562500e-02 : f32
    %39 = vector.broadcast %cst_19 : f32 to vector<32x1xf32>
    %40 = arith.mulf %38, %39 : vector<32x1xf32>
    %41 = arith.subf %24, %36 : vector<32x128xf32>
    %cst_20 = arith.constant dense<0.000000e+00> : vector<32xf32>
    %42 = vector.multi_reduction <add>, %41, %cst_20 [1] : vector<32x128xf32> to vector<32xf32>
    %43 = vector.shape_cast %42 : vector<32xf32> to vector<32x1xf32>
    %cst_21 = arith.constant 1.562500e-02 : f32
    %44 = vector.broadcast %cst_21 : f32 to vector<32x1xf32>
    %45 = arith.mulf %43, %44 : vector<32x1xf32>
    %46 = vector.shape_cast %18 : vector<1x128xi1> to vector<1x128xi1>
    %47 = vector.broadcast %46 : vector<1x128xi1> to vector<32x128xi1>
    %48 = vector.shape_cast %40 : vector<32x1xf32> to vector<32x1xf32>
    %49 = vector.broadcast %48 : vector<32x1xf32> to vector<32x128xf32>
    %50 = vector.shape_cast %45 : vector<32x1xf32> to vector<32x1xf32>
    %51 = vector.broadcast %50 : vector<32x1xf32> to vector<32x128xf32>
    %52 = arith.select %47, %49, %51 : vector<32x128xi1>, vector<32x128xf32>
    %cst_22 = arith.constant dense<0.000000e+00> : vector<32x128xf32>
    %53 = tpu.matmul %4, %24, %cst_22 {dimension_numbers = #tpu.dot_dimension_numbers<[1], [0], [0], [1], [0, 0, 1, 1], [], []>} : vector<32x32xf32>, vector<32x128xf32>, vector<32x128xf32> -> vector<32x128xf32>
    %cst_23 = arith.constant dense<0.000000e+00> : vector<32x128xf32>
    %54 = tpu.matmul %5, %32, %cst_23 {dimension_numbers = #tpu.dot_dimension_numbers<[1], [0], [0], [1], [0, 0, 1, 1], [], []>} : vector<32x32xf32>, vector<32x128xf32>, vector<32x128xf32> -> vector<32x128xf32>
    %55 = arith.addf %53, %54 : vector<32x128xf32>
    %cst_24 = arith.constant dense<0.000000e+00> : vector<32x128xf32>
    %56 = tpu.matmul %6, %52, %cst_24 {dimension_numbers = #tpu.dot_dimension_numbers<[1], [0], [0], [1], [0, 0, 1, 1], [], []>} : vector<32x32xf32>, vector<32x128xf32>, vector<32x128xf32> -> vector<32x128xf32>
    %57 = arith.addf %55, %56 : vector<32x128xf32>
    %58 = arith.addf %57, %14 : vector<32x128xf32>
    %cst_25 = arith.constant 0.000000e+00 : f32
    %59 = vector.broadcast %cst_25 : f32 to vector<32x128xf32>
    %60 = arith.cmpf ogt, %58, %59 : vector<32x128xf32>
    %cst_26 = arith.constant 0.00999999977 : f32
    %61 = vector.broadcast %cst_26 : f32 to vector<32x128xf32>
    %62 = arith.mulf %61, %58 : vector<32x128xf32>
    %63 = arith.select %60, %58, %62 : vector<32x128xi1>, vector<32x128xf32>
    %cst_27 = arith.constant dense<0.000000e+00> : vector<32x128xf32>
    %64 = tpu.matmul %3, %63, %cst_27 {dimension_numbers = #tpu.dot_dimension_numbers<[1], [0], [0], [1], [0, 0, 1, 1], [], []>} : vector<32x32xf32>, vector<32x128xf32>, vector<32x128xf32> -> vector<32x128xf32>
    %65 = arith.addf %64, %11 : vector<32x128xf32>
    %cst_28 = arith.constant 0.000000e+00 : f32
    %66 = vector.broadcast %cst_28 : f32 to vector<32x128xf32>
    %67 = arith.cmpf ogt, %65, %66 : vector<32x128xf32>
    %cst_29 = arith.constant 0.00999999977 : f32
    %68 = vector.broadcast %cst_29 : f32 to vector<32x128xf32>
    %69 = arith.mulf %68, %65 : vector<32x128xf32>
    %70 = arith.select %67, %65, %69 : vector<32x128xi1>, vector<32x128xf32>
    %cst_30 = arith.constant dense<0.000000e+00> : vector<32x128xf32>
    %71 = tpu.matmul %70, %1, %cst_30 {dimension_numbers = #tpu.dot_dimension_numbers<[1], [0], [0], [1], [0, 0, 1, 1], [], []>} : vector<32x128xf32>, vector<128x128xf32>, vector<32x128xf32> -> vector<32x128xf32>
    %cst_31 = arith.constant 0.000000e+00 : f32
    %72 = vector.shape_cast %18 : vector<1x128xi1> to vector<1x128xi1>
    %73 = vector.broadcast %72 : vector<1x128xi1> to vector<32x128xi1>
    %74 = vector.broadcast %cst_31 : f32 to vector<32x128xf32>
    %75 = arith.select %73, %63, %74 : vector<32x128xi1>, vector<32x128xf32>
    %cst_32 = arith.constant dense<0.000000e+00> : vector<32xf32>
    %76 = vector.multi_reduction <add>, %75, %cst_32 [1] : vector<32x128xf32> to vector<32xf32>
    %77 = vector.shape_cast %76 : vector<32xf32> to vector<32x1xf32>
    %cst_33 = arith.constant 1.562500e-02 : f32
    %78 = vector.broadcast %cst_33 : f32 to vector<32x1xf32>
    %79 = arith.mulf %77, %78 : vector<32x1xf32>
    %80 = arith.subf %63, %75 : vector<32x128xf32>
    %cst_34 = arith.constant dense<0.000000e+00> : vector<32xf32>
    %81 = vector.multi_reduction <add>, %80, %cst_34 [1] : vector<32x128xf32> to vector<32xf32>
    %82 = vector.shape_cast %81 : vector<32xf32> to vector<32x1xf32>
    %cst_35 = arith.constant 1.562500e-02 : f32
    %83 = vector.broadcast %cst_35 : f32 to vector<32x1xf32>
    %84 = arith.mulf %82, %83 : vector<32x1xf32>
    %85 = vector.shape_cast %18 : vector<1x128xi1> to vector<1x128xi1>
    %86 = vector.broadcast %85 : vector<1x128xi1> to vector<32x128xi1>
    %87 = vector.shape_cast %79 : vector<32x1xf32> to vector<32x1xf32>
    %88 = vector.broadcast %87 : vector<32x1xf32> to vector<32x128xf32>
    %89 = vector.shape_cast %84 : vector<32x1xf32> to vector<32x1xf32>
    %90 = vector.broadcast %89 : vector<32x1xf32> to vector<32x128xf32>
    %91 = arith.select %86, %88, %90 : vector<32x128xi1>, vector<32x128xf32>
    %cst_36 = arith.constant dense<0.000000e+00> : vector<32x128xf32>
    %92 = tpu.matmul %4, %63, %cst_36 {dimension_numbers = #tpu.dot_dimension_numbers<[1], [0], [0], [1], [0, 0, 1, 1], [], []>} : vector<32x32xf32>, vector<32x128xf32>, vector<32x128xf32> -> vector<32x128xf32>
    %cst_37 = arith.constant dense<0.000000e+00> : vector<32x128xf32>
    %93 = tpu.matmul %5, %71, %cst_37 {dimension_numbers = #tpu.dot_dimension_numbers<[1], [0], [0], [1], [0, 0, 1, 1], [], []>} : vector<32x32xf32>, vector<32x128xf32>, vector<32x128xf32> -> vector<32x128xf32>
    %94 = arith.addf %92, %93 : vector<32x128xf32>
    %cst_38 = arith.constant dense<0.000000e+00> : vector<32x128xf32>
    %95 = tpu.matmul %6, %91, %cst_38 {dimension_numbers = #tpu.dot_dimension_numbers<[1], [0], [0], [1], [0, 0, 1, 1], [], []>} : vector<32x32xf32>, vector<32x128xf32>, vector<32x128xf32> -> vector<32x128xf32>
    %96 = arith.addf %94, %95 : vector<32x128xf32>
    %97 = arith.addf %96, %14 : vector<32x128xf32>
    %cst_39 = arith.constant 0.000000e+00 : f32
    %98 = vector.broadcast %cst_39 : f32 to vector<32x128xf32>
    %99 = arith.cmpf ogt, %97, %98 : vector<32x128xf32>
    %cst_40 = arith.constant 0.00999999977 : f32
    %100 = vector.broadcast %cst_40 : f32 to vector<32x128xf32>
    %101 = arith.mulf %100, %97 : vector<32x128xf32>
    %102 = arith.select %99, %97, %101 : vector<32x128xi1>, vector<32x128xf32>
    %cst_41 = arith.constant dense<0.000000e+00> : vector<32x128xf32>
    %103 = tpu.matmul %3, %102, %cst_41 {dimension_numbers = #tpu.dot_dimension_numbers<[1], [0], [0], [1], [0, 0, 1, 1], [], []>} : vector<32x32xf32>, vector<32x128xf32>, vector<32x128xf32> -> vector<32x128xf32>
    %104 = arith.addf %103, %11 : vector<32x128xf32>
    %cst_42 = arith.constant 0.000000e+00 : f32
    %105 = vector.broadcast %cst_42 : f32 to vector<32x128xf32>
    %106 = arith.cmpf ogt, %104, %105 : vector<32x128xf32>
    %cst_43 = arith.constant 0.00999999977 : f32
    %107 = vector.broadcast %cst_43 : f32 to vector<32x128xf32>
    %108 = arith.mulf %107, %104 : vector<32x128xf32>
    %109 = arith.select %106, %104, %108 : vector<32x128xi1>, vector<32x128xf32>
    %cst_44 = arith.constant dense<0.000000e+00> : vector<32x128xf32>
    %110 = tpu.matmul %109, %1, %cst_44 {dimension_numbers = #tpu.dot_dimension_numbers<[1], [0], [0], [1], [0, 0, 1, 1], [], []>} : vector<32x128xf32>, vector<128x128xf32>, vector<32x128xf32> -> vector<32x128xf32>
    %cst_45 = arith.constant 0.000000e+00 : f32
    %111 = vector.shape_cast %18 : vector<1x128xi1> to vector<1x128xi1>
    %112 = vector.broadcast %111 : vector<1x128xi1> to vector<32x128xi1>
    %113 = vector.broadcast %cst_45 : f32 to vector<32x128xf32>
    %114 = arith.select %112, %102, %113 : vector<32x128xi1>, vector<32x128xf32>
    %cst_46 = arith.constant dense<0.000000e+00> : vector<32xf32>
    %115 = vector.multi_reduction <add>, %114, %cst_46 [1] : vector<32x128xf32> to vector<32xf32>
    %116 = vector.shape_cast %115 : vector<32xf32> to vector<32x1xf32>
    %cst_47 = arith.constant 1.562500e-02 : f32
    %117 = vector.broadcast %cst_47 : f32 to vector<32x1xf32>
    %118 = arith.mulf %116, %117 : vector<32x1xf32>
    %119 = arith.subf %102, %114 : vector<32x128xf32>
    %cst_48 = arith.constant dense<0.000000e+00> : vector<32xf32>
    %120 = vector.multi_reduction <add>, %119, %cst_48 [1] : vector<32x128xf32> to vector<32xf32>
    %121 = vector.shape_cast %120 : vector<32xf32> to vector<32x1xf32>
    %cst_49 = arith.constant 1.562500e-02 : f32
    %122 = vector.broadcast %cst_49 : f32 to vector<32x1xf32>
    %123 = arith.mulf %121, %122 : vector<32x1xf32>
    %124 = vector.shape_cast %18 : vector<1x128xi1> to vector<1x128xi1>
    %125 = vector.broadcast %124 : vector<1x128xi1> to vector<32x128xi1>
    %126 = vector.shape_cast %118 : vector<32x1xf32> to vector<32x1xf32>
    %127 = vector.broadcast %126 : vector<32x1xf32> to vector<32x128xf32>
    %128 = vector.shape_cast %123 : vector<32x1xf32> to vector<32x1xf32>
    %129 = vector.broadcast %128 : vector<32x1xf32> to vector<32x128xf32>
    %130 = arith.select %125, %127, %129 : vector<32x128xi1>, vector<32x128xf32>
    %cst_50 = arith.constant dense<0.000000e+00> : vector<32x128xf32>
    %131 = tpu.matmul %4, %102, %cst_50 {dimension_numbers = #tpu.dot_dimension_numbers<[1], [0], [0], [1], [0, 0, 1, 1], [], []>} : vector<32x32xf32>, vector<32x128xf32>, vector<32x128xf32> -> vector<32x128xf32>
    %cst_51 = arith.constant dense<0.000000e+00> : vector<32x128xf32>
    %132 = tpu.matmul %5, %110, %cst_51 {dimension_numbers = #tpu.dot_dimension_numbers<[1], [0], [0], [1], [0, 0, 1, 1], [], []>} : vector<32x32xf32>, vector<32x128xf32>, vector<32x128xf32> -> vector<32x128xf32>
    %133 = arith.addf %131, %132 : vector<32x128xf32>
    %cst_52 = arith.constant dense<0.000000e+00> : vector<32x128xf32>
    %134 = tpu.matmul %6, %130, %cst_52 {dimension_numbers = #tpu.dot_dimension_numbers<[1], [0], [0], [1], [0, 0, 1, 1], [], []>} : vector<32x32xf32>, vector<32x128xf32>, vector<32x128xf32> -> vector<32x128xf32>
    %135 = arith.addf %133, %134 : vector<32x128xf32>
    %136 = arith.addf %135, %14 : vector<32x128xf32>
    %cst_53 = arith.constant 0.000000e+00 : f32
    %137 = vector.broadcast %cst_53 : f32 to vector<32x128xf32>
    %138 = arith.cmpf ogt, %136, %137 : vector<32x128xf32>
    %cst_54 = arith.constant 0.00999999977 : f32
    %139 = vector.broadcast %cst_54 : f32 to vector<32x128xf32>
    %140 = arith.mulf %139, %136 : vector<32x128xf32>
    %141 = arith.select %138, %136, %140 : vector<32x128xi1>, vector<32x128xf32>
    %cst_55 = arith.constant dense<0.000000e+00> : vector<16x128xf32>
    %142 = tpu.matmul %7, %141, %cst_55 {dimension_numbers = #tpu.dot_dimension_numbers<[1], [0], [0], [1], [0, 0, 1, 1], [], []>} : vector<16x32xf32>, vector<32x128xf32>, vector<16x128xf32> -> vector<16x128xf32>
    %143 = vector.extract_strided_slice %142 {offsets = [0, 0], sizes = [4, 128], strides = [1, 1]} : vector<16x128xf32> to vector<4x128xf32>
    %cst_56 = arith.constant -1.000000e+30 : f32
    %144 = vector.shape_cast %18 : vector<1x128xi1> to vector<1x128xi1>
    %145 = vector.broadcast %144 : vector<1x128xi1> to vector<4x128xi1>
    %146 = vector.broadcast %cst_56 : f32 to vector<4x128xf32>
    %147 = arith.select %145, %143, %146 : vector<4x128xi1>, vector<4x128xf32>
    %cst_57 = arith.constant dense<0xFF800000> : vector<4xf32>
    %148 = vector.multi_reduction <maximumf>, %147, %cst_57 [1] : vector<4x128xf32> to vector<4xf32>
    %149 = vector.shape_cast %148 : vector<4xf32> to vector<4x1xf32>
    %cst_58 = arith.constant -1.000000e+30 : f32
    %150 = vector.shape_cast %18 : vector<1x128xi1> to vector<1x128xi1>
    %151 = vector.broadcast %150 : vector<1x128xi1> to vector<4x128xi1>
    %152 = vector.broadcast %cst_58 : f32 to vector<4x128xf32>
    %153 = arith.select %151, %152, %143 : vector<4x128xi1>, vector<4x128xf32>
    %cst_59 = arith.constant dense<0xFF800000> : vector<4xf32>
    %154 = vector.multi_reduction <maximumf>, %153, %cst_59 [1] : vector<4x128xf32> to vector<4xf32>
    %155 = vector.shape_cast %154 : vector<4xf32> to vector<4x1xf32>
    %156 = vector.shape_cast %18 : vector<1x128xi1> to vector<1x128xi1>
    %157 = vector.broadcast %156 : vector<1x128xi1> to vector<4x128xi1>
    %158 = vector.shape_cast %149 : vector<4x1xf32> to vector<4x1xf32>
    %159 = vector.broadcast %158 : vector<4x1xf32> to vector<4x128xf32>
    %160 = vector.shape_cast %155 : vector<4x1xf32> to vector<4x1xf32>
    %161 = vector.broadcast %160 : vector<4x1xf32> to vector<4x128xf32>
    %162 = arith.select %157, %159, %161 : vector<4x128xi1>, vector<4x128xf32>
    %163 = arith.subf %143, %162 : vector<4x128xf32>
    %164 = math.exp %163 : vector<4x128xf32>
    %cst_60 = arith.constant 0.000000e+00 : f32
    %165 = vector.shape_cast %18 : vector<1x128xi1> to vector<1x128xi1>
    %166 = vector.broadcast %165 : vector<1x128xi1> to vector<4x128xi1>
    %167 = vector.broadcast %cst_60 : f32 to vector<4x128xf32>
    %168 = arith.select %166, %164, %167 : vector<4x128xi1>, vector<4x128xf32>
    %cst_61 = arith.constant dense<0.000000e+00> : vector<4xf32>
    %169 = vector.multi_reduction <add>, %168, %cst_61 [1] : vector<4x128xf32> to vector<4xf32>
    %170 = vector.shape_cast %169 : vector<4xf32> to vector<4x1xf32>
    %cst_62 = arith.constant 0.000000e+00 : f32
    %171 = vector.shape_cast %18 : vector<1x128xi1> to vector<1x128xi1>
    %172 = vector.broadcast %171 : vector<1x128xi1> to vector<4x128xi1>
    %173 = vector.broadcast %cst_62 : f32 to vector<4x128xf32>
    %174 = arith.select %172, %173, %164 : vector<4x128xi1>, vector<4x128xf32>
    %cst_63 = arith.constant dense<0.000000e+00> : vector<4xf32>
    %175 = vector.multi_reduction <add>, %174, %cst_63 [1] : vector<4x128xf32> to vector<4xf32>
    %176 = vector.shape_cast %175 : vector<4xf32> to vector<4x1xf32>
    %177 = tpu.reciprocal %170 {approx = true} : vector<4x1xf32> -> vector<4x1xf32>
    %178 = tpu.reciprocal %176 {approx = true} : vector<4x1xf32> -> vector<4x1xf32>
    %179 = vector.shape_cast %18 : vector<1x128xi1> to vector<1x128xi1>
    %180 = vector.broadcast %179 : vector<1x128xi1> to vector<4x128xi1>
    %181 = vector.shape_cast %177 : vector<4x1xf32> to vector<4x1xf32>
    %182 = vector.broadcast %181 : vector<4x1xf32> to vector<4x128xf32>
    %183 = vector.shape_cast %178 : vector<4x1xf32> to vector<4x1xf32>
    %184 = vector.broadcast %183 : vector<4x1xf32> to vector<4x128xf32>
    %185 = arith.select %180, %182, %184 : vector<4x128xi1>, vector<4x128xf32>
    %186 = arith.mulf %164, %185 : vector<4x128xf32>
    %187 = vector.extract_strided_slice %142 {offsets = [4, 0], sizes = [5, 128], strides = [1, 1]} : vector<16x128xf32> to vector<5x128xf32>
    %cst_64 = arith.constant 0.000000e+00 : f32
    %188 = vector.shape_cast %18 : vector<1x128xi1> to vector<1x128xi1>
    %189 = vector.broadcast %188 : vector<1x128xi1> to vector<5x128xi1>
    %190 = vector.broadcast %cst_64 : f32 to vector<5x128xf32>
    %191 = arith.select %189, %187, %190 : vector<5x128xi1>, vector<5x128xf32>
    %cst_65 = arith.constant dense<0.000000e+00> : vector<5xf32>
    %192 = vector.multi_reduction <add>, %191, %cst_65 [1] : vector<5x128xf32> to vector<5xf32>
    %193 = vector.shape_cast %192 : vector<5xf32> to vector<5x1xf32>
    %cst_66 = arith.constant 1.562500e-02 : f32
    %194 = vector.broadcast %cst_66 : f32 to vector<5x1xf32>
    %195 = arith.mulf %193, %194 : vector<5x1xf32>
    %196 = arith.addf %195, %15 : vector<5x1xf32>
    %197 = arith.subf %187, %191 : vector<5x128xf32>
    %cst_67 = arith.constant dense<0.000000e+00> : vector<5xf32>
    %198 = vector.multi_reduction <add>, %197, %cst_67 [1] : vector<5x128xf32> to vector<5xf32>
    %199 = vector.shape_cast %198 : vector<5xf32> to vector<5x1xf32>
    %cst_68 = arith.constant 1.562500e-02 : f32
    %200 = vector.broadcast %cst_68 : f32 to vector<5x1xf32>
    %201 = arith.mulf %199, %200 : vector<5x1xf32>
    %202 = arith.addf %201, %15 : vector<5x1xf32>
    %203 = vector.extract_strided_slice %196 {offsets = [0, 0], sizes = [4, 1], strides = [1, 1]} : vector<5x1xf32> to vector<4x1xf32>
    %cst_69 = arith.constant dense<0xFF800000> : vector<1xf32>
    %204 = vector.multi_reduction <maximumf>, %203, %cst_69 [0] : vector<4x1xf32> to vector<1xf32>
    %205 = vector.shape_cast %204 : vector<1xf32> to vector<1x1xf32>
    %206 = vector.broadcast %205 : vector<1x1xf32> to vector<4x1xf32>
    %207 = arith.subf %203, %206 : vector<4x1xf32>
    %208 = math.exp %207 : vector<4x1xf32>
    %cst_70 = arith.constant dense<0.000000e+00> : vector<1xf32>
    %209 = vector.multi_reduction <add>, %208, %cst_70 [0] : vector<4x1xf32> to vector<1xf32>
    %210 = vector.shape_cast %209 : vector<1xf32> to vector<1x1xf32>
    %211 = tpu.reciprocal %210 {approx = true} : vector<1x1xf32> -> vector<1x1xf32>
    %212 = vector.broadcast %211 : vector<1x1xf32> to vector<4x1xf32>
    %213 = arith.mulf %208, %212 : vector<4x1xf32>
    %214 = vector.extract_strided_slice %196 {offsets = [4, 0], sizes = [1, 1], strides = [1, 1]} : vector<5x1xf32> to vector<1x1xf32>
    %215 = vector.extract_strided_slice %202 {offsets = [0, 0], sizes = [4, 1], strides = [1, 1]} : vector<5x1xf32> to vector<4x1xf32>
    %cst_71 = arith.constant dense<0xFF800000> : vector<1xf32>
    %216 = vector.multi_reduction <maximumf>, %215, %cst_71 [0] : vector<4x1xf32> to vector<1xf32>
    %217 = vector.shape_cast %216 : vector<1xf32> to vector<1x1xf32>
    %218 = vector.broadcast %217 : vector<1x1xf32> to vector<4x1xf32>
    %219 = arith.subf %215, %218 : vector<4x1xf32>
    %220 = math.exp %219 : vector<4x1xf32>
    %cst_72 = arith.constant dense<0.000000e+00> : vector<1xf32>
    %221 = vector.multi_reduction <add>, %220, %cst_72 [0] : vector<4x1xf32> to vector<1xf32>
    %222 = vector.shape_cast %221 : vector<1xf32> to vector<1x1xf32>
    %223 = tpu.reciprocal %222 {approx = true} : vector<1x1xf32> -> vector<1x1xf32>
    %224 = vector.broadcast %223 : vector<1x1xf32> to vector<4x1xf32>
    %225 = arith.mulf %220, %224 : vector<4x1xf32>
    %226 = vector.extract_strided_slice %202 {offsets = [4, 0], sizes = [1, 1], strides = [1, 1]} : vector<5x1xf32> to vector<1x1xf32>
    %c0_73 = arith.constant 0 : index
    %c0_74 = arith.constant 0 : index
    %227 = vector.load %arg3[%c0_73, %c0_74] : memref<16x128xf32, #tpu.memory_space<vmem>>, vector<4x128xf32>
    tpu.vector_store %arg3[%c0_73, %c0_74], %186 {strides = array<i32>} : memref<16x128xf32, #tpu.memory_space<vmem>>, vector<4x128xf32>,
    %228 = vector.shape_cast %18 : vector<1x128xi1> to vector<1x128xi1>
    %229 = vector.broadcast %228 : vector<1x128xi1> to vector<4x128xi1>
    %230 = vector.shape_cast %213 : vector<4x1xf32> to vector<4x1xf32>
    %231 = vector.broadcast %230 : vector<4x1xf32> to vector<4x128xf32>
    %232 = vector.shape_cast %225 : vector<4x1xf32> to vector<4x1xf32>
    %233 = vector.broadcast %232 : vector<4x1xf32> to vector<4x128xf32>
    %234 = arith.select %229, %231, %233 : vector<4x128xi1>, vector<4x128xf32>
    %c4 = arith.constant 4 : index
    %c0_75 = arith.constant 0 : index
    %235 = vector.load %arg3[%c4, %c0_75] : memref<16x128xf32, #tpu.memory_space<vmem>>, vector<4x128xf32>
    tpu.vector_store %arg3[%c4, %c0_75], %234 {strides = array<i32>} : memref<16x128xf32, #tpu.memory_space<vmem>>, vector<4x128xf32>,
    %236 = vector.shape_cast %214 : vector<1x1xf32> to vector<1x1xf32>
    %237 = vector.broadcast %236 : vector<1x1xf32> to vector<1x128xf32>
    %238 = vector.shape_cast %226 : vector<1x1xf32> to vector<1x1xf32>
    %239 = vector.broadcast %238 : vector<1x1xf32> to vector<1x128xf32>
    %240 = arith.select %18, %237, %239 : vector<1x128xi1>, vector<1x128xf32>
    %c8 = arith.constant 8 : index
    %c0_76 = arith.constant 0 : index
    %241 = vector.load %arg3[%c8, %c0_76] : memref<16x128xf32, #tpu.memory_space<vmem>>, vector<1x128xf32>
    tpu.vector_store %arg3[%c8, %c0_76], %240 {strides = array<i32>} : memref<16x128xf32, #tpu.memory_space<vmem>>, vector<1x128xf32>,
    %cst_77 = arith.constant 0.000000e+00 : f32
    %242 = vector.broadcast %cst_77 : f32 to vector<7x128xf32>
    %c9 = arith.constant 9 : index
    %c0_78 = arith.constant 0 : index
    %243 = vector.load %arg3[%c9, %c0_78] : memref<16x128xf32, #tpu.memory_space<vmem>>, vector<7x128xf32>
    tpu.vector_store %arg3[%c9, %c0_78], %242 {strides = array<i32>} : memref<16x128xf32, #tpu.memory_space<vmem>>, vector<7x128xf32>,
    return
  }
}

</mosaic_0001>

<bundles_post_ra>
// kernel: net_forward.1
= control target key start
LH: loop header
LB: loop body
LE: loop exit
PB: predicated region body
PF: predicated region fallthrough
CT: control target
= control target key end

     0   :  { %vm99_vm0 = vcmask 261120   ;;  %v2738_v3 = vmov 0   ;;  %v96_v16 = vlaneseq  ;;  %s2740_s20 = smov 126   ;;  %s3290_s0 = inlined_call_operand.vmem [shape: f32[32,128], index: 0, kind: input, shape index: {}]   ;;  %s3291_s2 = inlined_call_operand.vmem [shape: f32[208,32], index: 2, kind: input, shape index: {}]   ;;  %s3292_s1 = inlined_call_operand.vmem [shape: f32[128,128], index: 1, kind: input, shape index: {}]   ;;  %s3293_s3 = inlined_call_operand.vmem [shape: f32[16,128], index: 3, kind: output, shape index: {}]  }
   0x1   :  { %v14_v0 = vld [vmem:[%s3290_s0] sm:$0xff]  ;;  %v15_v1 = vld [vmem:[%s3290_s0 + $0x8] sm:$0xff]  ;;  %v16_v2 = vld [vmem:[%s3290_s0 + $0x10] sm:$0xff]  ;;  %2718 = vset.pattern.permute.xlu1 %v2738_v3  ;;  %2717 = vset.pattern.permute.xlu0 %v2738_v3 }
   0x2   :  { %v2481_v4 = vpack.c.bf16 %v15_v1, %v14_v0  ;;  %v17_v5 = vld [vmem:[%s3290_s0 + $0x18] sm:$0xff]  ;;  %v34_v6 = vld [vmem:[%s3291_s2] sm:$0xff]  ;;  %v2789_v9 = vld [vmem:[%s3291_s2 + $0xb0] sm:$0xff]  ;;  %v2823_v17 = vand.u32 127, %v96_v16 }
   0x3   :  { %v2485_v7 = vpack.c.bf16 %v17_v5, %v16_v2  ;;  %2182 = vmatprep.mubr.msk.f32.mxu0 %vm99_vm0, %v34_v6  ;;  %v2783_v8 = vld [vmem:[%s3291_s2 + $0xc0] sm:$0xff]  ;;  %v2794_v10 = vld [vmem:[%s3291_s2 + $0xc8] sm:$0xff]  ;;  %62 = vperm.xlu0 %2717, %v2789_v9   ;;  %v2800_v11 = vld [vmem:[%s3291_s2 + $0xb8] sm:$0xff] }
   0x4   :  { %2482 = vmatprep.subr.bf16.mxu0 %v2481_v4  ;;  %72 = vperm.xlu1 %2718, %v2783_v8   ;;  %v35_v12 = vld [vmem:[%s3291_s2 + $0x8] sm:$0xff]  ;;  %v36_v13 = vld [vmem:[%s3291_s2 + $0x10] sm:$0xff]  ;;  %v37_v14 = vld [vmem:[%s3291_s2 + $0x18] sm:$0xff]  ;;  %vm98_vm2 = vcmp.lt.s32.totalorder %v2823_v17, 64 }
   0x5   :  { %2484 = vmatpush3.bf16.msra.mxu0 %v2481_v4  ;;  %v2819_v15 = vld [vmem:[%s3291_s2 + $0x20] sm:$0xff]  ;;  %v2843_v38 = vld [vmem:[%s3291_s2 + $0x28] sm:$0xff]  ;;  %v2848_v39 = vld [vmem:[%s3291_s2 + $0x30] sm:$0xff] }
   0x6   :  { %2486 = vmatprep.subr.bf16.mxu0 %v2485_v7  ;;  %2196 = vmatprep.mubr.msk.f32.mxu1 %vm99_vm0, %v2819_v15  ;;  %v2857_v40 = vld [vmem:[%s3291_s2 + $0x38] sm:$0xff]  ;;  %v18_v43 = vld [vmem:[%s3292_s1] sm:$0xff]  ;;  %v19_v44 = vld [vmem:[%s3292_s1 + $0x8] sm:$0xff] }
   0x7   :  { %67 = vperm.xlu0 %2717, %v2800_v11   ;;  %v20_v45 = vld [vmem:[%s3292_s1 + $0x10] sm:$0xff]  ;;  %v2872_v46 = vpack.c.bf16 %v19_v44, %v18_v43  ;;  %v21_v47 = vld [vmem:[%s3292_s1 + $0x18] sm:$0xff]  ;;  %v22_v49 = vld [vmem:[%s3292_s1 + $0x20] sm:$0xff] }
   0x8   :  { %77 = vperm.xlu1 %2718, %v2794_v10   ;;  %v2877_v48 = vpack.c.bf16 %v21_v47, %v20_v45  ;;  %v23_v50 = vld [vmem:[%s3292_s1 + $0x28] sm:$0xff]  ;;  %v24_v52 = vld [vmem:[%s3292_s1 + $0x30] sm:$0xff]  ;;  %v25_v53 = vld [vmem:[%s3292_s1 + $0x38] sm:$0xff] }
   0x9   :  { %2488 = vmatpush3.bf16.msra.mxu0 %v2485_v7  ;;  %v2888_v51 = vpack.c.bf16 %v23_v50, %v22_v49  ;;  %v2898_v54 = vpack.c.bf16 %v25_v53, %v24_v52  ;;  %v26_v55 = vld [vmem:[%s3292_s1 + $0x40] sm:$0xff]  ;;  %v27_v56 = vld [vmem:[%s3292_s1 + $0x48] sm:$0xff]  ;;  %v28_v58 = vld [vmem:[%s3292_s1 + $0x50] sm:$0xff] }
   0xa   :  { %2498 = vmatprep.subr.bf16.mxu0 %v2872_v46  ;;  %v2908_v57 = vpack.c.bf16 %v27_v56, %v26_v55  ;;  %v29_v59 = vld [vmem:[%s3292_s1 + $0x58] sm:$0xff]  ;;  %v30_v61 = vld [vmem:[%s3292_s1 + $0x60] sm:$0xff]  ;;  %v31_v62 = vld [vmem:[%s3292_s1 + $0x68] sm:$0xff] }
   0xb   :  { %v2918_v60 = vpack.c.bf16 %v29_v59, %v28_v58  ;;  %v2929_v63 = vpack.c.bf16 %v31_v62, %v30_v61  ;;  %v32_v0 = vld [vmem:[%s3292_s1 + $0x70] sm:$0xff]  ;;  %v33_v1 = vld [vmem:[%s3292_s1 + $0x78] sm:$0xff]  ;;  %v3012_v61 = vld [vmem:[%s3291_s2 + $0x40] sm:$0xff] }
   0xc   :  { %2183 = vmatmul.mubr.msk.f32.vlgmr.msra.gmra.mrb[0].mxu0 %vm99_vm0, %v35_v12  ;;  %v2939_v2 = vpack.c.bf16 %v33_v1, %v32_v0  ;;  %v2994_v49 = vld [vmem:[%s3291_s2 + $0x70] sm:$0xff]  ;;  %v3004_v58 = vld [vmem:[%s3291_s2 + $0x78] sm:$0xff] }
   0xd   :  { %2185 = vmatprep.mubr.msk.f32.mxu0 %vm99_vm0, %v36_v13  ;;  %2500 = vmatpush3.bf16.msra.mxu0 %v2872_v46 }
   0xe   :  { %2502 = vmatprep.subr.bf16.mxu0 %v2877_v48 }
  0x10   :  { %2186 = vmatmul.mubr.msk.f32.gmra.mrb[2].mxu0 %vm99_vm0, %v37_v14 }
  0x11   :  { %2504 = vmatpush3.bf16.msra.mxu0 %v2877_v48 }
  0x12   :  { %2506 = vmatprep.subr.bf16.mxu0 %v2888_v51 }
  0x15   :  { %2508 = vmatpush3.bf16.msra.mxu0 %v2888_v51 }
  0x16   :  { %2510 = vmatprep.subr.bf16.mxu0 %v2898_v54 }
  0x19   :  { %2512 = vmatpush3.bf16.msra.mxu0 %v2898_v54 }
  0x1a   :  { %2514 = vmatprep.subr.bf16.mxu0 %v2908_v57 }
  0x1d   :  { %2516 = vmatpush3.bf16.msra.mxu0 %v2908_v57 }
  0x1e   :  { %2518 = vmatprep.subr.bf16.mxu0 %v2918_v60 }
  0x21   :  { %2520 = vmatpush3.bf16.msra.mxu0 %v2918_v60 }
  0x22   :  { %2522 = vmatprep.subr.bf16.mxu0 %v2929_v63 }
  0x25   :  { %2524 = vmatpush3.bf16.msra.mxu0 %v2929_v63 }
  0x26   :  { %2526 = vmatprep.subr.bf16.mxu0 %v2939_v2 }
  0x29   :  { %2528 = vmatpush3.bf16.msra.mxu0 %v2939_v2 }
  0x2a   :  { %2562 = vmatprep.subr.bf16.mxu0 %v2872_v46 }
  0x82   :  { %v2944_v4 = vpop.permute.xlu0 %62 }
  0x83   :  { %v2946_v5 = vpop.permute.xlu1 %72 }
  0x86   :  { %v2948_v6 = vpop.permute.xlu0 %67 }
  0xdf   :  { %v2184_v18 = vpop.f32.mrb[0].mxu0 }
  0xe0   :  { %vm198_vm1 = vcmp.gt.f32.partialorder %v2184_v18, 0.0  ;;  %v202_v19 = vmul.f32 0.01, %v2184_v18  ;;  %v178_v20 = vpop.f32.mrb[1].mxu0 }
  0xe1   :  { %vm197_vm3 = vcmp.gt.f32.partialorder %v178_v20, 0.0  ;;  %v201_v21 = vmul.f32 0.01, %v178_v20 }
  0xe2   :  { %v206_v22 = vsel %vm198_vm1, %v2184_v18, %v202_v19  ;;  %v2952_v18 = vpop.permute.xlu1 %77 }
  0xe3   :  { %v2187_v23 = vpop.f32.mrb[2].mxu0  ;;  %v406_v24 = vsel %vm98_vm2, %v206_v22, 0.0  ;;  %v205_v25 = vsel %vm197_vm3, %v178_v20, %v201_v21 }
  0xe4   :  { %vm200_vm4 = vcmp.gt.f32.partialorder %v2187_v23, 0.0  ;;  %v204_v26 = vmul.f32 0.01, %v2187_v23  ;;  %411 = vadd.xlane.f32.xlu1 %v406_v24  ;;  %v188_v27 = vpop.f32.mrb[3].mxu0  ;;  %v405_v28 = vsel %vm98_vm2, %v205_v25, 0.0  ;;  %v2830_v29 = vpack.c.bf16 %v206_v22, %v205_v25 }
  0xe5   :  { %vm199_vm5 = vcmp.gt.f32.partialorder %v188_v27, 0.0  ;;  %v203_v30 = vmul.f32 0.01, %v188_v27  ;;  %409 = vadd.xlane.f32.xlu0 %v405_v28  ;;  %v422_v32 = vsub.f32 %v206_v22, %v406_v24  ;;  %v421_v36 = vsub.f32 %v205_v25, %v405_v28 }
  0xe6   :  { %v208_v31 = vsel %vm200_vm4, %v2187_v23, %v204_v26  ;;  %2490 = vmatprep.subr.bf16.mxu1 %v2830_v29 }
  0xe7   :  { %2492 = vmatpush3.bf16.msra.mxu1 %v2830_v29  ;;  %v207_v33 = vsel %vm199_vm5, %v188_v27, %v203_v30  ;;  %v408_v41 = vsel %vm98_vm2, %v208_v31, 0.0 }
  0xe8   :  { %v407_v34 = vsel %vm98_vm2, %v207_v33, 0.0  ;;  %v2836_v35 = vpack.c.bf16 %v208_v31, %v207_v33  ;;  %v424_v42 = vsub.f32 %v208_v31, %v408_v41  ;;  %v2975_v31 = vld [vmem:[%s3291_s2 + $0x60] sm:$0xff] }
  0xe9   :  { %427 = vadd.xlane.f32.xlu0 %v422_v32  ;;  %413 = vadd.xlane.f32.xlu1 %v407_v34  ;;  %v423_v37 = vsub.f32 %v207_v33, %v407_v34  ;;  %v2739_v32 = vmov 1  }
  0xea   :  { %2494 = vmatprep.subr.bf16.mxu1 %v2836_v35  ;;  %2719 = vset.pattern.permute.xlu1 %v2739_v32 }
  0xeb   :  { %2496 = vmatpush3.bf16.msra.mxu1 %v2836_v35  ;;  %2720 = vset.pattern.permute.xlu0 %v2739_v32 }
  0xed   :  { %425 = vadd.xlane.f32.xlu0 %v421_v36  ;;  %429 = vadd.xlane.f32.xlu1 %v423_v37 }
  0xee   :  { %2197 = vmatmul.mubr.msk.f32.vlgmr.msra.gmra.mrb[0].mxu1 %vm99_vm0, %v2843_v38 }
  0xef   :  { %2199 = vmatprep.mubr.msk.f32.mxu1 %vm99_vm0, %v2848_v39 }
  0xf1   :  { %415 = vadd.xlane.f32.xlu0 %v408_v41 }
  0xf2   :  { %2200 = vmatmul.mubr.msk.f32.gmra.mrb[2].mxu1 %vm99_vm0, %v2857_v40 }
  0xf3   :  { %2248 = vmatprep.mubr.msk.f32.mxu1 %vm99_vm0, %v2975_v31 }
  0xf5   :  { %431 = vadd.xlane.f32.xlu0 %v424_v42 }
  0xfe   :  { %81 = vperm.xlu1 %2719, %v2789_v9  }
 0x102   :  { %89 = vperm.xlu1 %2719, %v2783_v8  }
 0x106   :  { %93 = vperm.xlu1 %2719, %v2794_v10  }
 0x10a   :  { %2722 = vset.pattern.permute.xlu1 %v2738_v3 }
 0x10b   :  { %85 = vperm.xlu0 %2720, %v2800_v11  }
 0x10f   :  { %2721 = vset.pattern.permute.xlu0 %v2738_v3  ;;  %v2988_v3 = vld [vmem:[%s3291_s2 + $0x68] sm:$0xff] }
 0x171   :  { %v412_v37 = vpop.xlane.xlu1 %411 }
 0x172   :  { %v410_v33 = vpop.xlane.xlu0 %409  ;;  %v418_v55 = vmul.f32 0.015625, %v412_v37 }
 0x173   :  { %v417_v50 = vmul.f32 0.015625, %v410_v33 }
 0x176   :  { %v428_v34 = vpop.xlane.xlu0 %427  ;;  %v414_v11 = vpop.xlane.xlu1 %413 }
 0x177   :  { %v434_v52 = vmul.f32 0.015625, %v428_v34 }
 0x179   :  { %v438_v0 = vsel %vm98_vm2, %v418_v55, %v434_v52 }
 0x17a   :  { %v426_v36 = vpop.xlane.xlu0 %425  ;;  %v430_v53 = vpop.xlane.xlu1 %429 }
 0x17b   :  { %v433_v47 = vmul.f32 0.015625, %v426_v36  ;;  %v435_v62 = vmul.f32 0.015625, %v430_v53 }
 0x17d   :  { %v437_v59 = vsel %vm98_vm2, %v417_v50, %v433_v47 }
 0x17e   :  { %v416_v44 = vpop.xlane.xlu0 %415  ;;  %v2545_v1 = vpack.c.bf16 %v438_v0, %v437_v59 }
 0x182   :  { %v432_v10 = vpop.xlane.xlu0 %431 }
 0x183   :  { %v436_v56 = vmul.f32 0.015625, %v432_v10 }
 0x1c1   :  { %v2198_v7 = vpop.f32.mrb[0].mxu1 }
 0x1c2   :  { %v293_v12 = vadd.f32 %v2198_v7, %v2948_v6  ;;  %v287_v13 = vpop.f32.mrb[1].mxu1  ;;  %v419_v7 = vmul.f32 0.015625, %v414_v11 }
 0x1c3   :  { %v288_v14 = vadd.f32 %v287_v13, %v2944_v4 }
 0x1c4   :  { %v311_v16 = vmul.f32 0.01, %v293_v12  ;;  %vm307_vm6 = vcmp.gt.f32.partialorder %v293_v12, 0.0 }
 0x1c5   :  { %v310_v19 = vmul.f32 0.01, %v288_v14  ;;  %v2201_v20 = vpop.f32.mrb[2].mxu1  ;;  %vm306_vm7 = vcmp.gt.f32.partialorder %v288_v14, 0.0 }
 0x1c6   :  { %v303_v21 = vadd.f32 %v2201_v20, %v2952_v18  ;;  %v297_v22 = vpop.f32.mrb[3].mxu1  ;;  %v315_v25 = vsel %vm307_vm6, %v293_v12, %v311_v16  ;;  %v3024_v12 = vld [vmem:[%s3291_s2 + $0x48] sm:$0xff]  ;;  %v3047_v20 = vld [vmem:[%s3291_s2 + $0x80] sm:$0xff] }
 0x1c7   :  { %v298_v23 = vadd.f32 %v297_v22, %v2946_v5  ;;  %v314_v24 = vsel %vm306_vm7, %v288_v14, %v310_v19  ;;  %v3031_v14 = vld [vmem:[%s3291_s2 + $0x50] sm:$0xff]  ;;  %v3042_v19 = vld [vmem:[%s3291_s2 + $0x58] sm:$0xff] }
 0x1c8   :  { %v313_v26 = vmul.f32 0.01, %v303_v21  ;;  %2234 = vmatprep.mubr.f32.mxu0 %v314_v24  ;;  %vm309_vm9 = vcmp.gt.f32.partialorder %v303_v21, 0.0  ;;  %v3061_v22 = vld [vmem:[%s3291_s2 + $0x90] sm:$0xff]  ;;  %v3076_v24 = vpop.permute.xlu1 %81 }
 0x1c9   :  { %v312_v27 = vmul.f32 0.01, %v298_v23  ;;  %2235 = vmatmul.mubr.f32.vlgmr.msra.gmra.mrb[4].mxu0 %v315_v25  ;;  %vm308_vm8 = vcmp.gt.f32.partialorder %v298_v23, 0.0 }
 0x1ca   :  { %2564 = vmatpush3.bf16.msra.mxu0 %v2872_v46  ;;  %v317_v30 = vsel %vm309_vm9, %v303_v21, %v313_v26  ;;  %v3056_v21 = vld [vmem:[%s3291_s2 + $0x88] sm:$0xff]  ;;  %v3080_v26 = vpop.permute.xlu0 %85 }
 0x1cb   :  { %v316_v28 = vsel %vm308_vm8, %v298_v23, %v312_v27  ;;  %2566 = vmatprep.subr.bf16.mxu0 %v2877_v48  ;;  %v3070_v23 = vld [vmem:[%s3291_s2 + $0x98] sm:$0xff] }
 0x1cc   :  { %2237 = vmatprep.mubr.f32.mxu0 %v316_v28  ;;  %v3078_v25 = vpop.permute.xlu1 %89 }
 0x1cd   :  { %2238 = vmatmul.mubr.f32.gmra.mrb[6].mxu0 %v317_v30 }
 0x1ce   :  { %2568 = vmatpush3.bf16.msra.mxu0 %v2877_v48 }
 0x1cf   :  { %2570 = vmatprep.subr.bf16.mxu0 %v2888_v51 }
 0x1d0   :  { %v3084_v34 = vpop.permute.xlu1 %93 }
 0x1d2   :  { %2572 = vmatpush3.bf16.msra.mxu0 %v2888_v51 }
 0x1d3   :  { %2574 = vmatprep.subr.bf16.mxu0 %v2898_v54 }
 0x1d6   :  { %2576 = vmatpush3.bf16.msra.mxu0 %v2898_v54 }
 0x1d7   :  { %2578 = vmatprep.subr.bf16.mxu0 %v2908_v57 }
 0x1da   :  { %2580 = vmatpush3.bf16.msra.mxu0 %v2908_v57 }
 0x1db   :  { %2582 = vmatprep.subr.bf16.mxu0 %v2918_v60 }
 0x1de   :  { %2584 = vmatpush3.bf16.msra.mxu0 %v2918_v60 }
 0x1df   :  { %2586 = vmatprep.subr.bf16.mxu0 %v2929_v63 }
 0x1e2   :  { %2588 = vmatpush3.bf16.msra.mxu0 %v2929_v63 }
 0x1e3   :  { %2590 = vmatprep.subr.bf16.mxu0 %v2939_v2 }
 0x1e6   :  { %2592 = vmatpush3.bf16.msra.mxu0 %v2939_v2 }
 0x1e7   :  { %2626 = vmatprep.subr.bf16.mxu0 %v2872_v46 }
 0x29c   :  { %v2236_v41 = vpop.f32.mrb[4].mxu0 }
 0x29d   :  { %v384_v42 = vpop.f32.mrb[5].mxu0 }
 0x29e   :  { %v2529_v43 = vpack.c.bf16 %v2236_v41, %v384_v42 }
 0x2a0   :  { %v2239_v45 = vpop.f32.mrb[6].mxu0  ;;  %2530 = vmatprep.subr.bf16.mxu1 %v2529_v43 }
 0x2a1   :  { %v394_v9 = vpop.f32.mrb[7].mxu0  ;;  %2532 = vmatpush3.bf16.msra.mxu1 %v2529_v43 }
 0x2a2   :  { %v2533_v8 = vpack.c.bf16 %v2239_v45, %v394_v9 }
 0x2a4   :  { %2534 = vmatprep.subr.bf16.mxu1 %v2533_v8 }
 0x2a5   :  { %2536 = vmatpush3.bf16.msra.mxu1 %v2533_v8 }
 0x2a6   :  { %2538 = vmatprep.subr.bf16.mxu1 %v2830_v29 }
 0x2a8   :  { %2249 = vmatmul.mubr.msk.f32.vlgmr.msra.gmra.mrb[4].mxu1 %vm99_vm0, %v2988_v3 }
 0x2a9   :  { %2540 = vmatpush3.bf16.msra.mxu1 %v2830_v29  ;;  %2251 = vmatprep.mubr.msk.f32.mxu1 %vm99_vm0, %v2994_v49  ;;  %v420_v29 = vmul.f32 0.015625, %v416_v44 }
 0x2aa   :  { %2542 = vmatprep.subr.bf16.mxu1 %v2836_v35 }
 0x2ab   :  { %v440_v13 = vsel %vm98_vm2, %v420_v29, %v436_v56 }
 0x2ac   :  { %2252 = vmatmul.mubr.msk.f32.gmra.mrb[6].mxu1 %vm99_vm0, %v3004_v58 }
 0x2ad   :  { %2544 = vmatpush3.bf16.msra.mxu1 %v2836_v35  ;;  %2262 = vmatprep.mubr.msk.f32.mxu1 %vm99_vm0, %v3012_v61  ;;  %v439_v35 = vsel %vm98_vm2, %v419_v7, %v435_v62 }
 0x2ae   :  { %2546 = vmatprep.subr.bf16.mxu1 %v2545_v1  ;;  %v2549_v16 = vpack.c.bf16 %v440_v13, %v439_v35 }
 0x2b0   :  { %2263 = vmatmul.mubr.msk.f32.vlgmr.msra.gmra.mrb[4].mxu1 %vm99_vm0, %v3024_v12 }
 0x2b1   :  { %2548 = vmatpush3.bf16.msra.mxu1 %v2545_v1  ;;  %2265 = vmatprep.mubr.msk.f32.mxu1 %vm99_vm0, %v3031_v14 }
 0x2b2   :  { %2550 = vmatprep.subr.bf16.mxu1 %v2549_v16 }
 0x2b4   :  { %2266 = vmatmul.mubr.msk.f32.gmra.mrb[6].mxu1 %vm99_vm0, %v3042_v19 }
 0x2b5   :  { %2552 = vmatpush3.bf16.msra.mxu1 %v2549_v16  ;;  %2276 = vmatprep.mubr.msk.f32.mxu1 %vm99_vm0, %v3047_v20 }
 0x2b8   :  { %2277 = vmatmul.mubr.msk.f32.vlgmr.msra.gmra.mrb[4].mxu1 %vm99_vm0, %v3056_v21 }
 0x2b9   :  { %2279 = vmatprep.mubr.msk.f32.mxu1 %vm99_vm0, %v3061_v22 }
 0x2bc   :  { %2280 = vmatmul.mubr.msk.f32.gmra.mrb[6].mxu1 %vm99_vm0, %v3070_v23 }
 0x2bd   :  { %2290 = vmatprep.mubr.msk.f32.mxu1 %vm99_vm0, %v2819_v15 }
 0x38b   :  { %v2278_v27 = vpop.f32.mrb[4].mxu1 }
 0x38c   :  { %v737_v28 = vadd.f32 %v2278_v27, %v3080_v26  ;;  %v713_v30 = vpop.f32.mrb[5].mxu1 }
 0x38d   :  { %v736_v32 = vadd.f32 %v713_v30, %v3076_v24 }
 0x38e   :  { %v745_v33 = vmul.f32 0.01, %v737_v28  ;;  %vm741_vm10 = vcmp.gt.f32.partialorder %v737_v28, 0.0 }
 0x38f   :  { %v744_v36 = vmul.f32 0.01, %v736_v32  ;;  %v2281_v37 = vpop.f32.mrb[6].mxu1  ;;  %vm740_vm11 = vcmp.gt.f32.partialorder %v736_v32, 0.0 }
 0x390   :  { %v739_v41 = vadd.f32 %v2281_v37, %v3084_v34  ;;  %v723_v42 = vpop.f32.mrb[7].mxu1  ;;  %v749_v43 = vsel %vm741_vm10, %v737_v28, %v745_v33 }
 0x391   :  { %v738_v44 = vadd.f32 %v723_v42, %v3078_v25  ;;  %v935_v45 = vsel %vm98_vm2, %v749_v43, 0.0  ;;  %v748_v9 = vsel %vm740_vm11, %v736_v32, %v744_v36 }
 0x392   :  { %vm743_vm12 = vcmp.gt.f32.partialorder %v739_v41, 0.0  ;;  %v747_v11 = vmul.f32 0.01, %v739_v41  ;;  %940 = vadd.xlane.f32.xlu0 %v935_v45  ;;  %v934_v8 = vsel %vm98_vm2, %v748_v9, 0.0  ;;  %v3092_v47 = vpack.c.bf16 %v749_v43, %v748_v9 }
 0x393   :  { %vm742_vm13 = vcmp.gt.f32.partialorder %v738_v44, 0.0  ;;  %v746_v10 = vmul.f32 0.01, %v738_v44  ;;  %938 = vadd.xlane.f32.xlu1 %v934_v8  ;;  %v951_v53 = vsub.f32 %v749_v43, %v935_v45  ;;  %v950_v62 = vsub.f32 %v748_v9, %v934_v8 }
 0x394   :  { %2554 = vmatprep.subr.bf16.mxu1 %v3092_v47  ;;  %v751_v50 = vsel %vm743_vm12, %v739_v41, %v747_v11 }
 0x395   :  { %v750_v52 = vsel %vm742_vm13, %v738_v44, %v746_v10  ;;  %2556 = vmatpush3.bf16.msra.mxu1 %v3092_v47  ;;  %v937_v55 = vsel %vm98_vm2, %v751_v50, 0.0 }
 0x396   :  { %v953_v56 = vsub.f32 %v751_v50, %v937_v55  ;;  %v3098_v59 = vpack.c.bf16 %v751_v50, %v750_v52  ;;  %v936_v29 = vsel %vm98_vm2, %v750_v52, 0.0 }
 0x397   :  { %956 = vadd.xlane.f32.xlu1 %v951_v53  ;;  %v952_v0 = vsub.f32 %v750_v52, %v936_v29 }
 0x398   :  { %960 = vadd.xlane.f32.xlu0 %v953_v56  ;;  %2558 = vmatprep.subr.bf16.mxu1 %v3098_v59 }
 0x399   :  { %2560 = vmatpush3.bf16.msra.mxu1 %v3098_v59 }
 0x39b   :  { %954 = vadd.xlane.f32.xlu1 %v950_v62 }
 0x39c   :  { %2291 = vmatmul.mubr.msk.f32.vlgmr.msra.gmra.mrb[8].mxu1 %vm99_vm0, %v2843_v38 }
 0x39d   :  { %2293 = vmatprep.mubr.msk.f32.mxu1 %vm99_vm0, %v2848_v39 }
 0x39f   :  { %944 = vadd.xlane.f32.xlu1 %v937_v55 }
 0x3a0   :  { %2294 = vmatmul.mubr.msk.f32.gmra.mrb[10].mxu1 %vm99_vm0, %v2857_v40 }
 0x3a1   :  { %2342 = vmatprep.mubr.msk.f32.mxu1 %vm99_vm0, %v2975_v31 }
 0x3a3   :  { %942 = vadd.xlane.f32.xlu1 %v936_v29 }
 0x3a7   :  { %958 = vadd.xlane.f32.xlu1 %v952_v0 }
 0x46f   :  { %v2292_v1 = vpop.f32.mrb[8].mxu1 }
 0x470   :  { %v824_v7 = vadd.f32 %v2292_v1, %v2948_v6  ;;  %v818_v13 = vpop.f32.mrb[9].mxu1 }
 0x471   :  { %v819_v35 = vadd.f32 %v818_v13, %v2944_v4 }
 0x472   :  { %v842_v16 = vmul.f32 0.01, %v824_v7  ;;  %vm838_vm14 = vcmp.gt.f32.partialorder %v824_v7, 0.0 }
 0x473   :  { %v841_v27 = vmul.f32 0.01, %v819_v35  ;;  %v2295_v28 = vpop.f32.mrb[10].mxu1  ;;  %vm837_vm15 = vcmp.gt.f32.partialorder %v819_v35, 0.0 }
 0x474   :  { %v834_v30 = vadd.f32 %v2295_v28, %v2952_v18  ;;  %v828_v32 = vpop.f32.mrb[11].mxu1  ;;  %v846_v37 = vsel %vm838_vm14, %v824_v7, %v842_v16 }
 0x475   :  { %v829_v33 = vadd.f32 %v828_v32, %v2946_v5  ;;  %v845_v36 = vsel %vm837_vm15, %v819_v35, %v841_v27 }
 0x476   :  { %v844_v41 = vmul.f32 0.01, %v834_v30  ;;  %2328 = vmatprep.mubr.f32.mxu0 %v845_v36  ;;  %vm840_vm3 = vcmp.gt.f32.partialorder %v834_v30, 0.0 }
 0x477   :  { %v843_v42 = vmul.f32 0.01, %v829_v33  ;;  %2329 = vmatmul.mubr.f32.vlgmr.msra.gmra.mrb[8].mxu0 %v846_v37  ;;  %vm839_vm1 = vcmp.gt.f32.partialorder %v829_v33, 0.0 }
 0x478   :  { %2628 = vmatpush3.bf16.msra.mxu0 %v2872_v46  ;;  %v848_v44 = vsel %vm840_vm3, %v834_v30, %v844_v41  ;;  %v939_v46 = vpop.xlane.xlu1 %938  ;;  %vm1820_vm3 = vcmask 1043456  }
 0x479   :  { %v847_v43 = vsel %vm839_vm1, %v829_v33, %v843_v42  ;;  %2630 = vmatprep.subr.bf16.mxu0 %v2877_v48  ;;  %vm1846_vm1 = vcmask 1047556  }
 0x47a   :  { %2331 = vmatprep.mubr.f32.mxu0 %v847_v43 }
 0x47b   :  { %2332 = vmatmul.mubr.f32.gmra.mrb[10].mxu0 %v848_v44 }
 0x47c   :  { %2632 = vmatpush3.bf16.msra.mxu0 %v2877_v48  ;;  %v957_v48 = vpop.xlane.xlu1 %956 }
 0x47d   :  { %2634 = vmatprep.subr.bf16.mxu0 %v2888_v51  ;;  %v963_v53 = vmul.f32 0.015625, %v957_v48 }
 0x480   :  { %2636 = vmatpush3.bf16.msra.mxu0 %v2888_v51  ;;  %v955_v51 = vpop.xlane.xlu1 %954 }
 0x481   :  { %2638 = vmatprep.subr.bf16.mxu0 %v2898_v54  ;;  %v962_v50 = vmul.f32 0.015625, %v955_v51 }
 0x484   :  { %2640 = vmatpush3.bf16.msra.mxu0 %v2898_v54  ;;  %v945_v54 = vpop.xlane.xlu1 %944 }
 0x485   :  { %2642 = vmatprep.subr.bf16.mxu0 %v2908_v57  ;;  %v949_v0 = vmul.f32 0.015625, %v945_v54 }
 0x488   :  { %2644 = vmatpush3.bf16.msra.mxu0 %v2908_v57  ;;  %v943_v57 = vpop.xlane.xlu1 %942 }
 0x489   :  { %2646 = vmatprep.subr.bf16.mxu0 %v2918_v60  ;;  %v948_v1 = vmul.f32 0.015625, %v943_v57 }
 0x48c   :  { %2648 = vmatpush3.bf16.msra.mxu0 %v2918_v60  ;;  %v959_v52 = vpop.xlane.xlu1 %958 }
 0x48d   :  { %2650 = vmatprep.subr.bf16.mxu0 %v2929_v63  ;;  %v964_v56 = vmul.f32 0.015625, %v959_v52 }
 0x490   :  { %2652 = vmatpush3.bf16.msra.mxu0 %v2929_v63  ;;  %v941_v63 = vpop.xlane.xlu0 %940 }
 0x491   :  { %2654 = vmatprep.subr.bf16.mxu0 %v2939_v2  ;;  %v947_v55 = vmul.f32 0.015625, %v941_v63 }
 0x493   :  { %v967_v7 = vsel %vm98_vm2, %v947_v55, %v963_v53 }
 0x494   :  { %2656 = vmatpush3.bf16.msra.mxu0 %v2939_v2  ;;  %v946_v2 = vmul.f32 0.015625, %v939_v46  ;;  %v961_v29 = vpop.xlane.xlu0 %960 }
 0x495   :  { %v965_v35 = vmul.f32 0.015625, %v961_v29 }
 0x496   :  { %v966_v62 = vsel %vm98_vm2, %v946_v2, %v962_v50 }
 0x497   :  { %v2609_v13 = vpack.c.bf16 %v967_v7, %v966_v62  ;;  %v969_v16 = vsel %vm98_vm2, %v949_v0, %v965_v35 }
 0x54a   :  { %v2330_v45 = vpop.f32.mrb[8].mxu0 }
 0x54b   :  { %v915_v9 = vpop.f32.mrb[9].mxu0 }
 0x54c   :  { %v2593_v11 = vpack.c.bf16 %v2330_v45, %v915_v9 }
 0x54e   :  { %v2333_v8 = vpop.f32.mrb[10].mxu0  ;;  %2594 = vmatprep.subr.bf16.mxu1 %v2593_v11 }
 0x54f   :  { %v925_v10 = vpop.f32.mrb[11].mxu0  ;;  %2596 = vmatpush3.bf16.msra.mxu1 %v2593_v11 }
 0x550   :  { %v2597_v60 = vpack.c.bf16 %v2333_v8, %v925_v10 }
 0x552   :  { %2598 = vmatprep.subr.bf16.mxu1 %v2597_v60 }
 0x553   :  { %2600 = vmatpush3.bf16.msra.mxu1 %v2597_v60 }
 0x554   :  { %2602 = vmatprep.subr.bf16.mxu1 %v3092_v47 }
 0x556   :  { %2343 = vmatmul.mubr.msk.f32.vlgmr.msra.gmra.mrb[12].mxu1 %vm99_vm0, %v2988_v3 }
 0x557   :  { %2604 = vmatpush3.bf16.msra.mxu1 %v3092_v47  ;;  %2345 = vmatprep.mubr.msk.f32.mxu1 %vm99_vm0, %v2994_v49  ;;  %v968_v47 = vsel %vm98_vm2, %v948_v1, %v964_v56 }
 0x558   :  { %2606 = vmatprep.subr.bf16.mxu1 %v3098_v59  ;;  %v2613_v27 = vpack.c.bf16 %v969_v16, %v968_v47 }
 0x55a   :  { %2346 = vmatmul.mubr.msk.f32.gmra.mrb[14].mxu1 %vm99_vm0, %v3004_v58 }
 0x55b   :  { %2608 = vmatpush3.bf16.msra.mxu1 %v3098_v59  ;;  %2356 = vmatprep.mubr.msk.f32.mxu1 %vm99_vm0, %v3012_v61 }
 0x55c   :  { %2610 = vmatprep.subr.bf16.mxu1 %v2609_v13 }
 0x55e   :  { %2357 = vmatmul.mubr.msk.f32.vlgmr.msra.gmra.mrb[12].mxu1 %vm99_vm0, %v3024_v12 }
 0x55f   :  { %2612 = vmatpush3.bf16.msra.mxu1 %v2609_v13  ;;  %2359 = vmatprep.mubr.msk.f32.mxu1 %vm99_vm0, %v3031_v14 }
 0x560   :  { %2614 = vmatprep.subr.bf16.mxu1 %v2613_v27 }
 0x562   :  { %2360 = vmatmul.mubr.msk.f32.gmra.mrb[14].mxu1 %vm99_vm0, %v3042_v19 }
 0x563   :  { %2616 = vmatpush3.bf16.msra.mxu1 %v2613_v27  ;;  %2370 = vmatprep.mubr.msk.f32.mxu1 %vm99_vm0, %v3047_v20 }
 0x566   :  { %2371 = vmatmul.mubr.msk.f32.vlgmr.msra.gmra.mrb[12].mxu1 %vm99_vm0, %v3056_v21 }
 0x567   :  { %2373 = vmatprep.mubr.msk.f32.mxu1 %vm99_vm0, %v3061_v22 }
 0x56a   :  { %2374 = vmatmul.mubr.msk.f32.gmra.mrb[14].mxu1 %vm99_vm0, %v3070_v23 }
 0x56b   :  { %2384 = vmatprep.mubr.msk.f32.mxu1 %vm99_vm0, %v2819_v15 }
 0x639   :  { %v2372_v59 = vpop.f32.mrb[12].mxu1 }
 0x63a   :  { %v1230_v28 = vadd.f32 %v2372_v59, %v3080_v26  ;;  %v1206_v30 = vpop.f32.mrb[13].mxu1 }
 0x63b   :  { %v1229_v32 = vadd.f32 %v1206_v30, %v3076_v24 }
 0x63c   :  { %v1238_v33 = vmul.f32 0.01, %v1230_v28  ;;  %vm1234_vm4 = vcmp.gt.f32.partialorder %v1230_v28, 0.0 }
 0x63d   :  { %v1237_v36 = vmul.f32 0.01, %v1229_v32  ;;  %v2375_v37 = vpop.f32.mrb[14].mxu1  ;;  %vm1233_vm5 = vcmp.gt.f32.partialorder %v1229_v32, 0.0 }
 0x63e   :  { %v1232_v41 = vadd.f32 %v2375_v37, %v3084_v34  ;;  %v1216_v42 = vpop.f32.mrb[15].mxu1  ;;  %v1242_v43 = vsel %vm1234_vm4, %v1230_v28, %v1238_v33  ;;  %vm1874_vm4 = vcmask 7172  }
 0x63f   :  { %v1231_v44 = vadd.f32 %v1216_v42, %v3078_v25  ;;  %v1428_v15 = vsel %vm98_vm2, %v1242_v43, 0.0  ;;  %v1241_v46 = vsel %vm1233_vm5, %v1229_v32, %v1237_v36  ;;  %vm1888_vm5 = vcmask 3072  }
 0x640   :  { %vm1236_vm6 = vcmp.gt.f32.partialorder %v1232_v41, 0.0  ;;  %v1240_v48 = vmul.f32 0.01, %v1232_v41  ;;  %1433 = vadd.xlane.f32.xlu0 %v1428_v15  ;;  %v1427_v51 = vsel %vm98_vm2, %v1241_v46, 0.0  ;;  %v3175_v54 = vpack.c.bf16 %v1242_v43, %v1241_v46 }
 0x641   :  { %vm1235_vm7 = vcmp.gt.f32.partialorder %v1231_v44, 0.0  ;;  %v1239_v45 = vmul.f32 0.01, %v1231_v44  ;;  %1431 = vadd.xlane.f32.xlu1 %v1427_v51  ;;  %v1444_v11 = vsub.f32 %v1242_v43, %v1428_v15  ;;  %v1443_v8 = vsub.f32 %v1241_v46, %v1427_v51 }
 0x642   :  { %v1244_v9 = vsel %vm1236_vm6, %v1232_v41, %v1240_v48  ;;  %2618 = vmatprep.subr.bf16.mxu1 %v3175_v54 }
 0x643   :  { %v1243_v57 = vsel %vm1235_vm7, %v1231_v44, %v1239_v45  ;;  %2620 = vmatpush3.bf16.msra.mxu1 %v3175_v54  ;;  %v1430_v60 = vsel %vm98_vm2, %v1244_v9, 0.0 }
 0x644   :  { %v3179_v10 = vpack.c.bf16 %v1244_v9, %v1243_v57  ;;  %1449 = vadd.xlane.f32.xlu0 %v1444_v11  ;;  %v1429_v50 = vsel %vm98_vm2, %v1243_v57, 0.0  ;;  %v1446_v63 = vsub.f32 %v1244_v9, %v1430_v60 }
 0x645   :  { %1447 = vadd.xlane.f32.xlu1 %v1443_v8  ;;  %v1445_v52 = vsub.f32 %v1243_v57, %v1429_v50 }
 0x646   :  { %2622 = vmatprep.subr.bf16.mxu1 %v3179_v10 }
 0x647   :  { %2624 = vmatpush3.bf16.msra.mxu1 %v3179_v10 }
 0x648   :  { %1437 = vadd.xlane.f32.xlu0 %v1430_v60 }
 0x649   :  { %1435 = vadd.xlane.f32.xlu1 %v1429_v50 }
 0x64a   :  { %2385 = vmatmul.mubr.msk.f32.vlgmr.msra.gmra.mrb[16].mxu1 %vm99_vm0, %v2843_v38 }
 0x64b   :  { %2387 = vmatprep.mubr.msk.f32.mxu1 %vm99_vm0, %v2848_v39 }
 0x64c   :  { %1453 = vadd.xlane.f32.xlu0 %v1446_v63 }
 0x64d   :  { %1451 = vadd.xlane.f32.xlu1 %v1445_v52 }
 0x64e   :  { %2388 = vmatmul.mubr.msk.f32.gmra.mrb[18].mxu1 %vm99_vm0, %v2857_v40 }
 0x64f   :  { %2436 = vmatprep.mubr.msk.f32.mxu1 %vm99_vm0, %v2975_v31 }
 0x6cd   :  { %v1434_v35 = vpop.xlane.xlu0 %1433 }
 0x6ce   :  { %v1432_v47 = vpop.xlane.xlu1 %1431  ;;  %v1440_v44 = vmul.f32 0.015625, %v1434_v35 }
 0x6cf   :  { %v1439_v15 = vmul.f32 0.015625, %v1432_v47 }
 0x6d1   :  { %v1450_v16 = vpop.xlane.xlu0 %1449 }
 0x6d2   :  { %v1448_v27 = vpop.xlane.xlu1 %1447  ;;  %v1456_v37 = vmul.f32 0.015625, %v1450_v16 }
 0x6d3   :  { %v1455_v41 = vmul.f32 0.015625, %v1448_v27 }
 0x6d4   :  { %v1460_v45 = vsel %vm98_vm2, %v1440_v44, %v1456_v37 }
 0x6d5   :  { %v1459_v51 = vsel %vm98_vm2, %v1439_v15, %v1455_v41 }
 0x6d6   :  { %v1436_v30 = vpop.xlane.xlu1 %1435 }
 0x6d7   :  { %v1441_v11 = vmul.f32 0.015625, %v1436_v30 }
 0x6da   :  { %v1452_v43 = vpop.xlane.xlu1 %1451 }
 0x6db   :  { %v1457_v48 = vmul.f32 0.015625, %v1452_v43 }
 0x71d   :  { %v2386_v2 = vpop.f32.mrb[16].mxu1 }
 0x71e   :  { %v1317_v53 = vadd.f32 %v2386_v2, %v2948_v6  ;;  %v1311_v55 = vpop.f32.mrb[17].mxu1 }
 0x71f   :  { %v1312_v56 = vadd.f32 %v1311_v55, %v2944_v4 }
 0x720   :  { %v1335_v38 = vmul.f32 0.01, %v1317_v53  ;;  %vm1331_vm8 = vcmp.gt.f32.partialorder %v1317_v53, 0.0 }
 0x721   :  { %v1334_v62 = vmul.f32 0.01, %v1312_v56  ;;  %v2389_v29 = vpop.f32.mrb[18].mxu1  ;;  %vm1330_vm9 = vcmp.gt.f32.partialorder %v1312_v56, 0.0 }
 0x722   :  { %v1327_v39 = vadd.f32 %v2389_v29, %v2952_v18  ;;  %v1321_v0 = vpop.f32.mrb[19].mxu1  ;;  %v1339_v7 = vsel %vm1331_vm8, %v1317_v53, %v1335_v38 }
 0x723   :  { %v1322_v1 = vadd.f32 %v1321_v0, %v2946_v5  ;;  %v1338_v40 = vsel %vm1330_vm9, %v1312_v56, %v1334_v62  ;;  %v1438_v5 = vpop.xlane.xlu0 %1437 }
 0x724   :  { %v1337_v13 = vmul.f32 0.01, %v1327_v39  ;;  %2422 = vmatprep.mubr.f32.mxu0 %v1338_v40  ;;  %vm1333_vm11 = vcmp.gt.f32.partialorder %v1327_v39, 0.0  ;;  %v1442_v9 = vmul.f32 0.015625, %v1438_v5 }
 0x725   :  { %v1336_v31 = vmul.f32 0.01, %v1322_v1  ;;  %2423 = vmatmul.mubr.f32.vlgmr.msra.gmra.mrb[12].mxu0 %v1339_v7  ;;  %vm1332_vm10 = vcmp.gt.f32.partialorder %v1322_v1, 0.0 }
 0x726   :  { %v1341_v4 = vsel %vm1333_vm11, %v1327_v39, %v1337_v13 }
 0x727   :  { %v1340_v6 = vsel %vm1332_vm10, %v1322_v1, %v1336_v31  ;;  %v1454_v42 = vpop.xlane.xlu0 %1453 }
 0x728   :  { %2425 = vmatprep.mubr.f32.mxu0 %v1340_v6  ;;  %v1458_v46 = vmul.f32 0.015625, %v1454_v42  ;;  %v2737_v6 = vld [vmem:[%s3291_s2 + $0xb0] sm:$0xff] }
 0x729   :  { %2426 = vmatmul.mubr.f32.gmra.mrb[14].mxu0 %v1341_v4  ;;  %v1856_v4 = vrot.slane %v2737_v6, 4  ;;  %v2741_v6 = vmov 0.0  }
 0x72a   :  { %1945 = vst [vmem:[%s3293_s3 + $0x9] sm:$0x7f] %v2741_v6 }
 0x7f8   :  { %v2424_v18 = vpop.f32.mrb[12].mxu0 }
 0x7f9   :  { %v1408_v59 = vpop.f32.mrb[13].mxu0 }
 0x7fa   :  { %v2657_v28 = vpack.c.bf16 %v2424_v18, %v1408_v59 }
 0x7fc   :  { %v2427_v32 = vpop.f32.mrb[14].mxu0  ;;  %2658 = vmatprep.subr.bf16.mxu1 %v2657_v28 }
 0x7fd   :  { %v1418_v33 = vpop.f32.mrb[15].mxu0  ;;  %2660 = vmatpush3.bf16.msra.mxu1 %v2657_v28 }
 0x7fe   :  { %v2661_v36 = vpack.c.bf16 %v2427_v32, %v1418_v33 }
 0x800   :  { %2662 = vmatprep.subr.bf16.mxu1 %v2661_v36 }
 0x801   :  { %2664 = vmatpush3.bf16.msra.mxu1 %v2661_v36 }
 0x802   :  { %2666 = vmatprep.subr.bf16.mxu1 %v3175_v54 }
 0x804   :  { %2437 = vmatmul.mubr.msk.f32.vlgmr.msra.gmra.mrb[20].mxu1 %vm99_vm0, %v2988_v3  ;;  %v2673_v3 = vpack.c.bf16 %v1460_v45, %v1459_v51 }
 0x805   :  { %2668 = vmatpush3.bf16.msra.mxu1 %v3175_v54  ;;  %2439 = vmatprep.mubr.msk.f32.mxu1 %vm99_vm0, %v2994_v49  ;;  %v1461_v49 = vsel %vm98_vm2, %v1441_v11, %v1457_v48  ;;  %v1462_v54 = vsel %vm98_vm2, %v1442_v9, %v1458_v46 }
 0x806   :  { %2670 = vmatprep.subr.bf16.mxu1 %v3179_v10  ;;  %v2677_v57 = vpack.c.bf16 %v1462_v54, %v1461_v49 }
 0x808   :  { %2440 = vmatmul.mubr.msk.f32.gmra.mrb[22].mxu1 %vm99_vm0, %v3004_v58  ;;  %v54_v58 = vld [vmem:[%s3291_s2 + $0xa0] sm:$0xff] }
 0x809   :  { %2672 = vmatpush3.bf16.msra.mxu1 %v3179_v10  ;;  %2450 = vmatprep.mubr.msk.f32.mxu1 %vm99_vm0, %v3012_v61 }
 0x80a   :  { %2674 = vmatprep.subr.bf16.mxu1 %v2673_v3 }
 0x80c   :  { %2451 = vmatmul.mubr.msk.f32.vlgmr.msra.gmra.mrb[20].mxu1 %vm99_vm0, %v3024_v12 }
 0x80d   :  { %2676 = vmatpush3.bf16.msra.mxu1 %v2673_v3  ;;  %2453 = vmatprep.mubr.msk.f32.mxu1 %vm99_vm0, %v3031_v14 }
 0x80e   :  { %2678 = vmatprep.subr.bf16.mxu1 %v2677_v57 }
 0x810   :  { %2454 = vmatmul.mubr.msk.f32.gmra.mrb[22].mxu1 %vm99_vm0, %v3042_v19 }
 0x811   :  { %2680 = vmatpush3.bf16.msra.mxu1 %v2677_v57  ;;  %2464 = vmatprep.mubr.msk.f32.mxu1 %vm99_vm0, %v3047_v20 }
 0x814   :  { %2465 = vmatmul.mubr.msk.f32.vlgmr.msra.gmra.mrb[20].mxu1 %vm99_vm0, %v3056_v21 }
 0x815   :  { %2467 = vmatprep.mubr.msk.f32.mxu1 %vm99_vm0, %v3061_v22 }
 0x818   :  { %2468 = vmatmul.mubr.msk.f32.gmra.mrb[22].mxu1 %vm99_vm0, %v3070_v23 }
 0x819   :  { %2478 = vmatprep.mubr.msk.f32.mxu1 %vm99_vm0, %v54_v58 }
 0x8e7   :  { %v2466_v61 = vpop.f32.mrb[20].mxu1 }
 0x8e8   :  { %v1723_v12 = vadd.f32 %v2466_v61, %v3080_v26  ;;  %v1699_v14 = vpop.f32.mrb[21].mxu1 }
 0x8e9   :  { %v1722_v19 = vadd.f32 %v1699_v14, %v3076_v24 }
 0x8ea   :  { %vm1727_vm12 = vcmp.gt.f32.partialorder %v1723_v12, 0.0  ;;  %v1731_v20 = vmul.f32 0.01, %v1723_v12 }
 0x8eb   :  { %vm1726_vm13 = vcmp.gt.f32.partialorder %v1722_v19, 0.0  ;;  %v1730_v21 = vmul.f32 0.01, %v1722_v19  ;;  %v2469_v22 = vpop.f32.mrb[22].mxu1 }
 0x8ec   :  { %v1725_v8 = vadd.f32 %v2469_v22, %v3084_v34  ;;  %v1709_v23 = vpop.f32.mrb[23].mxu1  ;;  %v1735_v10 = vsel %vm1727_vm12, %v1723_v12, %v1731_v20  ;;  %v55_v34 = vld [vmem:[%s3291_s2 + $0xa8] sm:$0xff] }
 0x8ed   :  { %v1724_v60 = vadd.f32 %v1709_v23, %v3078_v25  ;;  %v1734_v50 = vsel %vm1726_vm13, %v1722_v19, %v1730_v21 }
 0x8ee   :  { %vm1729_vm14 = vcmp.gt.f32.partialorder %v1725_v8, 0.0  ;;  %v1733_v63 = vmul.f32 0.01, %v1725_v8  ;;  %v2681_v52 = vpack.c.bf16 %v1735_v10, %v1734_v50 }
 0x8ef   :  { %vm1728_vm15 = vcmp.gt.f32.partialorder %v1724_v60, 0.0  ;;  %v1732_v26 = vmul.f32 0.01, %v1724_v60 }
 0x8f0   :  { %2682 = vmatprep.subr.bf16.mxu1 %v2681_v52  ;;  %v1737_v2 = vsel %vm1729_vm14, %v1725_v8, %v1733_v63 }
 0x8f1   :  { %2684 = vmatpush3.bf16.msra.mxu1 %v2681_v52  ;;  %v1736_v24 = vsel %vm1728_vm15, %v1724_v60, %v1732_v26 }
 0x8f2   :  { %v2685_v53 = vpack.c.bf16 %v1737_v2, %v1736_v24 }
 0x8f4   :  { %2686 = vmatprep.subr.bf16.mxu1 %v2685_v53 }
 0x8f5   :  { %2688 = vmatpush3.bf16.msra.mxu1 %v2685_v53 }
 0x8f8   :  { %2479 = vmatmul.mubr.msk.f32.vlgmr.msra.gmra.mrb[24].mxu1 %vm99_vm0, %v55_v34  ;;  %vm1850_vm0 = vcmask 1040384  }
 0x9cb   :  { %v2480_v25 = vpop.f32.mrb[24].mxu1 }
 0x9cc   :  { %v1810_v55 = vpop.f32.mrb[25].mxu1  ;;  %v1845_v7 = vsel %vm98_vm2, %v2480_v25, 0.0 }
 0x9cd   :  { %v1844_v56 = vsel %vm98_vm2, %v1810_v55, 0.0  ;;  %v1819_v39 = vsel %vm98_vm2, %v1810_v55, -1e+30  ;;  %v1824_v1 = vsel %vm98_vm2, -1e+30, %v1810_v55  ;;  %v1851_v13 = vsel %vm1850_vm0, %v1845_v7, 0.0 }
 0x9ce   :  { %v1847_v38 = vsel %vm1846_vm1, %v1844_v56, 0.0  ;;  %v1862_v62 = vsub.f32 %v1810_v55, %v1844_v56  ;;  %v1821_v0 = vsel %vm1820_vm3, %v1819_v39, -inf  ;;  %v1825_v40 = vsel %vm1820_vm3, %v1824_v1, -inf }
 0x9cf   :  { %1848 = vadd.xlane.f32.xlu1 %v1847_v38  ;;  %v1863_v31 = vsub.f32 %v2480_v25, %v1845_v7 }
 0x9d0   :  { %v1864_v29 = vsel %vm1846_vm1, %v1862_v62, 0.0 }
 0x9d1   :  { %1865 = vadd.xlane.f32.xlu0 %v1864_v29  ;;  %v1867_v35 = vsel %vm1850_vm0, %v1863_v31, 0.0 }
 0x9d5   :  { %1822 = vmax.xlane.f32.xlu0 %v1821_v0 }
 0x9d9   :  { %1826 = vmax.xlane.f32.xlu0 %v1825_v40 }
 0x9dd   :  { %1852 = vadd.xlane.f32.xlu0 %v1851_v13 }
 0x9e0   :  { %1857 = vrot.lane.b32.xlu1 %v1856_v4, %s2740_s20 }
 0x9e1   :  { %1868 = vadd.xlane.f32.xlu0 %v1867_v35 }
 0xa5c   :  { %v1849_v47 = vpop.xlane.xlu1 %1848 }
 0xa5d   :  { %v1854_v27 = vmul.f32 0.015625, %v1849_v47 }
 0xa5e   :  { %v1866_v16 = vpop.xlane.xlu0 %1865 }
 0xa5f   :  { %v1870_v18 = vmul.f32 0.015625, %v1866_v16 }
 0xa60   :  { %v3258_v59 = vpop.permute.xlu1 %1857 }
 0xa61   :  { %v1860_v28 = vadd.f32 %v3258_v59, %v1854_v27  ;;  %v1872_v5 = vadd.f32 %v1870_v18, %v3258_v59 }
 0xa62   :  { %v1823_v30 = vpop.xlane.xlu0 %1822 }
 0xa63   :  { %v1875_v32 = vsel %vm1874_vm4, %v1860_v28, -inf  ;;  %v1898_v33 = vsel %vm1874_vm4, %v1872_v5, -inf }
 0xa64   :  { %v1876_v36 = vrot.slane %v1875_v32, 4  ;;  %v1899_v37 = vrot.slane %v1898_v33, 4 }
 0xa66   :  { %v1877_v41 = vmax.f32 %v1875_v32, %v1876_v36  ;;  %v1900_v42 = vmax.f32 %v1898_v33, %v1899_v37  ;;  %v1827_v43 = vpop.xlane.xlu0 %1826 }
 0xa67   :  { %v1828_v44 = vsel %vm98_vm2, %v1823_v30, %v1827_v43 }
 0xa68   :  { %v1878_v15 = vrot.slane %v1877_v41, 2  ;;  %v1901_v46 = vrot.slane %v1900_v42, 2  ;;  %v1829_v48 = vsub.f32 %v1810_v55, %v1828_v44 }
 0xa6a   :  { %v1879_v51 = vmax.f32 %v1877_v41, %v1878_v15  ;;  %v1902_v45 = vmax.f32 %v1900_v42, %v1901_v46  ;;  %v1830_v9 = vmul.f32 1.442695, %v1829_v48  ;;  %v1853_v39 = vpop.xlane.xlu0 %1852 }
 0xa6b   :  { %v1855_v40 = vmul.f32 0.015625, %v1853_v39 }
 0xa6c   :  { %v1880_v11 = vrot.slane %v1879_v51, 1  ;;  %v1903_v3 = vrot.slane %v1902_v45, 1  ;;  %2723 = vpow2.f32 %v1830_v9 }
 0xa6d   :  { %v1861_v4 = vadd.f32 %v3258_v59, %v1855_v40 }
 0xa6e   :  { %v1881_v49 = vmax.f32 %v1879_v51, %v1880_v11  ;;  %v1904_v54 = vmax.f32 %v1902_v45, %v1903_v3  ;;  %v1869_v13 = vpop.xlane.xlu0 %1868 }
 0xa6f   :  { %v1871_v35 = vmul.f32 0.015625, %v1869_v13 }
 0xa70   :  { %v1882_v57 = vsub.f32 %v1860_v28, %v1881_v49  ;;  %v1905_v58 = vsub.f32 %v1872_v5, %v1904_v54 }
 0xa71   :  { %v1873_v47 = vadd.f32 %v1871_v35, %v3258_v59 }
 0xa72   :  { %v1883_v61 = vmul.f32 1.442695, %v1882_v57  ;;  %v1906_v12 = vmul.f32 1.442695, %v1905_v58 }
 0xa74   :  { %2725 = vpow2.f32 %v1883_v61 }
 0xa75   :  { %2727 = vpow2.f32 %v1906_v12 }
 0xa76   :  { %v2724_v14 = vpop.eup %2723 }
 0xa77   :  { %v1836_v19 = vsel %vm98_vm2, 0.0, %v2724_v14  ;;  %v1832_v20 = vsel %vm98_vm2, %v2724_v14, 0.0 }
 0xa78   :  { %v1837_v21 = vsel %vm1820_vm3, %v1836_v19, 0.0  ;;  %v1833_v22 = vsel %vm1820_vm3, %v1832_v20, 0.0 }
 0xa79   :  { %1838 = vadd.xlane.f32.xlu1 %v1837_v21  ;;  %1834 = vadd.xlane.f32.xlu0 %v1833_v22 }
 0xa7e   :  { %v2726_v8 = vpop.eup %2725 }
 0xa7f   :  { %v2728_v23 = vpop.eup %2727  ;;  %v1886_v10 = vrot.slane %v2726_v8, 4 }
 0xa80   :  { %v1909_v60 = vrot.slane %v2728_v23, 4 }
 0xa81   :  { %v1889_v50 = vsel %vm1888_vm5, %v1886_v10, 0.0 }
 0xa82   :  { %v1911_v63 = vsel %vm1888_vm5, %v1909_v60, 0.0  ;;  %v1890_v52 = vrot.slane %v1889_v50, 4 }
 0xa83   :  { %v1912_v26 = vrot.slane %v1911_v63, 4 }
 0xa84   :  { %v1891_v2 = vadd.f32 %v1890_v52, %v1889_v50 }
 0xa85   :  { %v1913_v24 = vadd.f32 %v1912_v26, %v1911_v63 }
 0xa86   :  { %v1892_v53 = vrot.slane %v1891_v2, 2 }
 0xa87   :  { %v1914_v34 = vrot.slane %v1913_v24, 2 }
 0xa88   :  { %v1893_v25 = vadd.f32 %v1892_v53, %v1891_v2 }
 0xa89   :  { %v1915_v55 = vadd.f32 %v1914_v34, %v1913_v24 }
 0xa8a   :  { %v1894_v56 = vrot.slane %v1893_v25, 1 }
 0xa8b   :  { %v1916_v38 = vrot.slane %v1915_v55, 1 }
 0xa8c   :  { %v1895_v62 = vadd.f32 %v1894_v56, %v1893_v25 }
 0xa8d   :  { %v1917_v29 = vadd.f32 %v1916_v38, %v1915_v55 }
 0xa8e   :  { %2729 = vrcp.f32 %v1895_v62 }
 0xa8f   :  { %2731 = vrcp.f32 %v1917_v29 }
 0xa98   :  { %v2730_v0 = vpop.eup %2729 }
 0xa99   :  { %v2732_v1 = vpop.eup %2731  ;;  %v1897_v7 = vmul.f32 %v2730_v0, %v2726_v8 }
 0xa9a   :  { %v1919_v31 = vmul.f32 %v2732_v1, %v2728_v23 }
 0xa9b   :  { %1923 = vperm.xlu0 %2721, %v1897_v7  }
 0xa9c   :  { %1928 = vperm.xlu1 %2722, %v1919_v31  }
 0xa9f   :  { %1935 = vperm.xlu0 %2721, %v1861_v4  }
 0xaa3   :  { %1940 = vperm.xlu0 %2721, %v1873_v47  }
 0xb06   :  { %v1839_v16 = vpop.xlane.xlu1 %1838  ;;  %v1835_v27 = vpop.xlane.xlu0 %1834 }
 0xb07   :  { %2733 = vrcp.f32 %v1839_v16 }
 0xb08   :  { %2735 = vrcp.f32 %v1835_v27 }
 0xb11   :  { %v2734_v18 = vpop.eup %2733 }
 0xb12   :  { %v2736_v28 = vpop.eup %2735 }
 0xb13   :  { %v1842_v5 = vsel %vm98_vm2, %v2736_v28, %v2734_v18 }
 0xb14   :  { %v1843_v30 = vmul.f32 %v2724_v14, %v1842_v5 }
 0xb16   :  { %1920 = vst [vmem:[%s3293_s3] sm:$0xf] %v1843_v30 }
 0xb1a   :  { %v1924_v32 = vpop.permute.xlu0 %1923 }
 0xb1b   :  { %v1929_v33 = vpop.permute.xlu1 %1928 }
 0xb1c   :  { %v1931_v59 = vsel %vm98_vm2, %v1924_v32, %v1929_v33 }
 0xb1d   :  { %1932 = vst [vmem:[%s3293_s3] sm:$0xf0] %v1931_v59 }
 0xb1e   :  { %v1936_v36 = vpop.permute.xlu0 %1935 }
 0xb22   :  { %v1941_v37 = vpop.permute.xlu0 %1940 }
 0xb23   :  { %v1943_v41 = vsel %vm98_vm2, %v1936_v36, %v1941_v37 }
 0xb24   :  { %1944 = vst [vmem:[%s3293_s3 + $0x8] sm:$0x1] %v1943_v41 }

</bundles_post_ra>
